<compile_context>
chip_gen: v7x
topology: tpu7x:2x2x1
jax: 0.10.0
libtpu: 0.0.40
codegen_flags: <defaults>
</compile_context>

<pallas_src>
import jax
import jax.numpy as jnp
import numpy as np
from jax import lax
from jax.experimental import pallas as pl
from jax.experimental.pallas import tpu as pltpu


_GELU_C0 = 0.7978845608028654              # sqrt(2/pi)
_GELU_C1 = 0.7978845608028654 * 0.044715   # folded constant: c0 * 0.044715


def _gelu_tail(v):
    # 0.5*v*(1 + tanh(c0*v + c0*0.044715*v^3)) with constants folded.
    t = jnp.tanh(v * (_GELU_C0 + _GELU_C1 * (v * v)))
    return v * (0.5 * t + 0.5)


def _conv1x1_gelu_pad_kernel(w_ref, b_ref, x_ref, o_ref):
    # w_ref: (C,) f32 SMEM, b_ref: (1,) f32 SMEM,
    # x_ref: (C, H, W) f32 VMEM, o_ref: (H+2, W+2) f32 VMEM.
    C, H, W = x_ref.shape
    bias = b_ref[0]

    # ---- 1x1 conv == channel-weighted sum + bias (VPU, static unroll, C = 9).
    # Two accumulators break the C-deep serial add chain.
    acc0 = jnp.full((H, W), bias, dtype=jnp.float32) + x_ref[0] * w_ref[0]
    acc1 = x_ref[1] * w_ref[1]
    for c in range(2, C):
        term = x_ref[c] * w_ref[c]
        if c % 2 == 0:
            acc0 = acc0 + term
        else:
            acc1 = acc1 + term
    acc = acc0 + acc1

    # ---- GELU tail on the aligned (H, W) interior (EUP tanh, folded consts).
    res = _gelu_tail(acc)                                        # (H, W)

    # ---- Border value: the zero-padded 1x1 conv sees only zeros on the border,
    # so its value there is exactly GELU(bias).  Compute it on one vector row.
    border_row = _gelu_tail(jnp.full((1, W + 2), bias, dtype=jnp.float32))

    # ---- Shift the interior right by one lane into a (H, W+2) frame using an
    # exact 0/1 shift matrix on the otherwise-idle MXU: shifted[:, j] = res[:, j-1]
    # for 1 <= j <= W, and 0 in columns 0 and W+1.  This keeps every store below
    # lane-aligned.  HIGHEST precision => exact f32 pass-through (weights are
    # exactly 0.0 / 1.0).
    row = lax.broadcasted_iota(jnp.int32, (W, W + 2), 0)
    col = lax.broadcasted_iota(jnp.int32, (W, W + 2), 1)
    shift = jnp.where(col == row + 1, 1.0, 0.0).astype(jnp.float32)
    shifted = jnp.dot(res, shift,
                      precision=lax.Precision.HIGHEST,
                      preferred_element_type=jnp.float32)        # (H, W+2)

    lane = lax.broadcasted_iota(jnp.int32, (H, W + 2), 1)
    is_border_col = (lane == 0) | (lane == W + 1)
    middle = jnp.where(is_border_col, border_row, shifted)       # (H, W+2)

    # ---- Emit the padded output with lane-aligned stores only
    # (masked tail lanes / sublane offset 1 are cheap and well supported).
    o_ref[0:1, :] = border_row                 # top border row
    o_ref[H + 1:H + 2, :] = border_row         # bottom border row
    o_ref[1:H + 1, :] = middle                 # interior rows


@jax.jit
def model_forward(x_nchw, weight, bias):
    """x_nchw: (1, 9, H, W) f32; weight: (1, 9, 1, 1); bias: (1,).
    Returns (1, 1, H+2, W+2) f32 (Conv2d padding=1 with a 1x1 kernel + GELU tail)."""
    assert x_nchw.shape[0] == 1 and x_nchw.shape[1] == weight.shape[1]
    x = x_nchw[0]                                    # (C, H, W)
    C, H, W = x.shape
    w_flat = weight.reshape(C).astype(jnp.float32)   # (C,)
    b_flat = bias.reshape(1).astype(jnp.float32)     # (1,)

    out = pl.pallas_call(
        _conv1x1_gelu_pad_kernel,
        out_shape=jax.ShapeDtypeStruct((H + 2, W + 2), jnp.float32),
        in_specs=[
            pl.BlockSpec(memory_space=pltpu.MemorySpace.SMEM),   # conv weights
            pl.BlockSpec(memory_space=pltpu.MemorySpace.SMEM),   # conv bias
            pl.BlockSpec(memory_space=pltpu.MemorySpace.VMEM),   # input (C, H, W)
        ],
        out_specs=pl.BlockSpec(memory_space=pltpu.MemorySpace.VMEM),
    )(w_flat, b_flat, x.astype(jnp.float32))

    return out[None, None]                           # (1, 1, H+2, W+2)


def _reference(x_nchw, weight, bias):
    # Pure-JAX reference mirroring the PyTorch module exactly (elementwise
    # channel sum — no MXU — to keep the reference at full f32 precision).
    xpad = jnp.pad(x_nchw, ((0, 0), (0, 0), (1, 1), (1, 1)))
    w = weight.reshape(1, -1, 1, 1)
    v1 = jnp.sum(xpad * w, axis=1, keepdims=True) + bias.reshape(1, -1, 1, 1)
    v2 = v1 * 0.5
    v3 = v1 * v1 * v1
    v5 = v1 + v3 * 0.044715
    v7 = jnp.tanh(v5 * 0.7978845608028654)
    return v2 * (v7 + 1.0)


if __name__ == "__main__":
    key = jax.random.PRNGKey(0)
    kx, kw, kb = jax.random.split(key, 3)

    # Shapes implied by the module: Conv2d(9 -> 1, k=1, pad=1), input NCHW.
    N, C, H, W = 1, 9, 128, 128
    x2 = jax.random.normal(kx, (N, C, H, W), dtype=jnp.float32)

    # Deterministic parameter init (Conv2d weight (1, 9, 1, 1), bias (1,)).
    bound = 1.0 / np.sqrt(C * 1 * 1)
    weight = jax.random.uniform(kw, (1, C, 1, 1), jnp.float32, -bound, bound)
    bias = jax.random.uniform(kb, (1,), jnp.float32, -bound, bound)

    out = jax.block_until_ready(model_forward(x2, weight, bias))

    ref = _reference(x2, weight, bias)
    assert out.shape == (1, 1, H + 2, W + 2), out.shape
    np.testing.assert_allclose(np.asarray(out), np.asarray(ref),
                               rtol=1e-5, atol=1e-5)
    print("KERNEL_OK")
</pallas_src>

<mosaic_0001>
module attributes {stable_mosaic.version = 11 : i64} {
  func.func @_conv1x1_gelu_pad_kernel(%arg0: memref<9xf32, #tpu.memory_space<smem>>, %arg1: memref<1xf32, #tpu.memory_space<smem>>, %arg2: memref<9x128x128xf32, #tpu.memory_space<vmem>>, %arg3: memref<130x130xf32, #tpu.memory_space<vmem>>) attributes {dimension_semantics = [], scalar_prefetch = 0 : i64, scratch_operands = 0 : i64, tpu.core_type = #tpu.core_type<tc>} {
    %c0 = arith.constant 0 : index
    %0 = memref.load %arg1[%c0] : memref<1xf32, #tpu.memory_space<smem>>
    %1 = vector.broadcast %0 : f32 to vector<128x128xf32>
    %c0_0 = arith.constant 0 : index
    %c0_1 = arith.constant 0 : index
    %c0_2 = arith.constant 0 : index
    %2 = vector.load %arg2[%c0_0, %c0_1, %c0_2] : memref<9x128x128xf32, #tpu.memory_space<vmem>>, vector<1x128x128xf32>
    %3 = vector.shape_cast %2 : vector<1x128x128xf32> to vector<128x128xf32>
    %c0_3 = arith.constant 0 : index
    %4 = memref.load %arg0[%c0_3] : memref<9xf32, #tpu.memory_space<smem>>
    %5 = vector.broadcast %4 : f32 to vector<128x128xf32>
    %6 = arith.mulf %3, %5 : vector<128x128xf32>
    %7 = arith.addf %1, %6 : vector<128x128xf32>
    %c1 = arith.constant 1 : index
    %c0_4 = arith.constant 0 : index
    %c0_5 = arith.constant 0 : index
    %8 = vector.load %arg2[%c1, %c0_4, %c0_5] : memref<9x128x128xf32, #tpu.memory_space<vmem>>, vector<1x128x128xf32>
    %9 = vector.shape_cast %8 : vector<1x128x128xf32> to vector<128x128xf32>
    %c1_6 = arith.constant 1 : index
    %10 = memref.load %arg0[%c1_6] : memref<9xf32, #tpu.memory_space<smem>>
    %11 = vector.broadcast %10 : f32 to vector<128x128xf32>
    %12 = arith.mulf %9, %11 : vector<128x128xf32>
    %c2 = arith.constant 2 : index
    %c0_7 = arith.constant 0 : index
    %c0_8 = arith.constant 0 : index
    %13 = vector.load %arg2[%c2, %c0_7, %c0_8] : memref<9x128x128xf32, #tpu.memory_space<vmem>>, vector<1x128x128xf32>
    %14 = vector.shape_cast %13 : vector<1x128x128xf32> to vector<128x128xf32>
    %c2_9 = arith.constant 2 : index
    %15 = memref.load %arg0[%c2_9] : memref<9xf32, #tpu.memory_space<smem>>
    %16 = vector.broadcast %15 : f32 to vector<128x128xf32>
    %17 = arith.mulf %14, %16 : vector<128x128xf32>
    %18 = arith.addf %7, %17 : vector<128x128xf32>
    %c3 = arith.constant 3 : index
    %c0_10 = arith.constant 0 : index
    %c0_11 = arith.constant 0 : index
    %19 = vector.load %arg2[%c3, %c0_10, %c0_11] : memref<9x128x128xf32, #tpu.memory_space<vmem>>, vector<1x128x128xf32>
    %20 = vector.shape_cast %19 : vector<1x128x128xf32> to vector<128x128xf32>
    %c3_12 = arith.constant 3 : index
    %21 = memref.load %arg0[%c3_12] : memref<9xf32, #tpu.memory_space<smem>>
    %22 = vector.broadcast %21 : f32 to vector<128x128xf32>
    %23 = arith.mulf %20, %22 : vector<128x128xf32>
    %24 = arith.addf %12, %23 : vector<128x128xf32>
    %c4 = arith.constant 4 : index
    %c0_13 = arith.constant 0 : index
    %c0_14 = arith.constant 0 : index
    %25 = vector.load %arg2[%c4, %c0_13, %c0_14] : memref<9x128x128xf32, #tpu.memory_space<vmem>>, vector<1x128x128xf32>
    %26 = vector.shape_cast %25 : vector<1x128x128xf32> to vector<128x128xf32>
    %c4_15 = arith.constant 4 : index
    %27 = memref.load %arg0[%c4_15] : memref<9xf32, #tpu.memory_space<smem>>
    %28 = vector.broadcast %27 : f32 to vector<128x128xf32>
    %29 = arith.mulf %26, %28 : vector<128x128xf32>
    %30 = arith.addf %18, %29 : vector<128x128xf32>
    %c5 = arith.constant 5 : index
    %c0_16 = arith.constant 0 : index
    %c0_17 = arith.constant 0 : index
    %31 = vector.load %arg2[%c5, %c0_16, %c0_17] : memref<9x128x128xf32, #tpu.memory_space<vmem>>, vector<1x128x128xf32>
    %32 = vector.shape_cast %31 : vector<1x128x128xf32> to vector<128x128xf32>
    %c5_18 = arith.constant 5 : index
    %33 = memref.load %arg0[%c5_18] : memref<9xf32, #tpu.memory_space<smem>>
    %34 = vector.broadcast %33 : f32 to vector<128x128xf32>
    %35 = arith.mulf %32, %34 : vector<128x128xf32>
    %36 = arith.addf %24, %35 : vector<128x128xf32>
    %c6 = arith.constant 6 : index
    %c0_19 = arith.constant 0 : index
    %c0_20 = arith.constant 0 : index
    %37 = vector.load %arg2[%c6, %c0_19, %c0_20] : memref<9x128x128xf32, #tpu.memory_space<vmem>>, vector<1x128x128xf32>
    %38 = vector.shape_cast %37 : vector<1x128x128xf32> to vector<128x128xf32>
    %c6_21 = arith.constant 6 : index
    %39 = memref.load %arg0[%c6_21] : memref<9xf32, #tpu.memory_space<smem>>
    %40 = vector.broadcast %39 : f32 to vector<128x128xf32>
    %41 = arith.mulf %38, %40 : vector<128x128xf32>
    %42 = arith.addf %30, %41 : vector<128x128xf32>
    %c7 = arith.constant 7 : index
    %c0_22 = arith.constant 0 : index
    %c0_23 = arith.constant 0 : index
    %43 = vector.load %arg2[%c7, %c0_22, %c0_23] : memref<9x128x128xf32, #tpu.memory_space<vmem>>, vector<1x128x128xf32>
    %44 = vector.shape_cast %43 : vector<1x128x128xf32> to vector<128x128xf32>
    %c7_24 = arith.constant 7 : index
    %45 = memref.load %arg0[%c7_24] : memref<9xf32, #tpu.memory_space<smem>>
    %46 = vector.broadcast %45 : f32 to vector<128x128xf32>
    %47 = arith.mulf %44, %46 : vector<128x128xf32>
    %48 = arith.addf %36, %47 : vector<128x128xf32>
    %c8 = arith.constant 8 : index
    %c0_25 = arith.constant 0 : index
    %c0_26 = arith.constant 0 : index
    %49 = vector.load %arg2[%c8, %c0_25, %c0_26] : memref<9x128x128xf32, #tpu.memory_space<vmem>>, vector<1x128x128xf32>
    %50 = vector.shape_cast %49 : vector<1x128x128xf32> to vector<128x128xf32>
    %c8_27 = arith.constant 8 : index
    %51 = memref.load %arg0[%c8_27] : memref<9xf32, #tpu.memory_space<smem>>
    %52 = vector.broadcast %51 : f32 to vector<128x128xf32>
    %53 = arith.mulf %50, %52 : vector<128x128xf32>
    %54 = arith.addf %42, %53 : vector<128x128xf32>
    %55 = arith.addf %54, %48 : vector<128x128xf32>
    %56 = arith.mulf %55, %55 : vector<128x128xf32>
    %cst = arith.constant 0.0356774069 : f32
    %57 = vector.broadcast %cst : f32 to vector<128x128xf32>
    %58 = arith.mulf %57, %56 : vector<128x128xf32>
    %cst_28 = arith.constant 0.797884583 : f32
    %59 = vector.broadcast %cst_28 : f32 to vector<128x128xf32>
    %60 = arith.addf %59, %58 : vector<128x128xf32>
    %61 = arith.mulf %55, %60 : vector<128x128xf32>
    %62 = math.tanh %61 : vector<128x128xf32>
    %cst_29 = arith.constant 5.000000e-01 : f32
    %63 = vector.broadcast %cst_29 : f32 to vector<128x128xf32>
    %64 = arith.mulf %63, %62 : vector<128x128xf32>
    %cst_30 = arith.constant 5.000000e-01 : f32
    %65 = vector.broadcast %cst_30 : f32 to vector<128x128xf32>
    %66 = arith.addf %64, %65 : vector<128x128xf32>
    %67 = arith.mulf %55, %66 : vector<128x128xf32>
    %68 = vector.broadcast %0 : f32 to vector<1x130xf32>
    %69 = arith.mulf %68, %68 : vector<1x130xf32>
    %cst_31 = arith.constant 0.0356774069 : f32
    %70 = vector.broadcast %cst_31 : f32 to vector<1x130xf32>
    %71 = arith.mulf %70, %69 : vector<1x130xf32>
    %cst_32 = arith.constant 0.797884583 : f32
    %72 = vector.broadcast %cst_32 : f32 to vector<1x130xf32>
    %73 = arith.addf %72, %71 : vector<1x130xf32>
    %74 = arith.mulf %68, %73 : vector<1x130xf32>
    %75 = math.tanh %74 : vector<1x130xf32>
    %cst_33 = arith.constant 5.000000e-01 : f32
    %76 = vector.broadcast %cst_33 : f32 to vector<1x130xf32>
    %77 = arith.mulf %76, %75 : vector<1x130xf32>
    %cst_34 = arith.constant 5.000000e-01 : f32
    %78 = vector.broadcast %cst_34 : f32 to vector<1x130xf32>
    %79 = arith.addf %77, %78 : vector<1x130xf32>
    %80 = arith.mulf %68, %79 : vector<1x130xf32>
    %81 = tpu.iota {dimensions = array<i32: 0>} : vector<128x130xi32>
    %82 = tpu.iota {dimensions = array<i32: 1>} : vector<128x130xi32>
    %c1_i32 = arith.constant 1 : i32
    %83 = vector.broadcast %c1_i32 : i32 to vector<128x130xi32>
    %84 = arith.addi %81, %83 : vector<128x130xi32>
    %85 = arith.cmpi eq, %82, %84 : vector<128x130xi32>
    %cst_35 = arith.constant 1.000000e+00 : f32
    %cst_36 = arith.constant 0.000000e+00 : f32
    %86 = vector.broadcast %cst_35 : f32 to vector<128x130xf32>
    %87 = vector.broadcast %cst_36 : f32 to vector<128x130xf32>
    %88 = arith.select %85, %86, %87 : vector<128x130xi1>, vector<128x130xf32>
    %cst_37 = arith.constant dense<0.000000e+00> : vector<128x130xf32>
    %89 = tpu.matmul %67, %88, %cst_37 {dimension_numbers = #tpu.dot_dimension_numbers<[1], [0], [0], [1], [0, 0, 1, 1], [], []>, precision = #tpu.contract_precision<fp32>} : vector<128x128xf32>, vector<128x130xf32>, vector<128x130xf32> -> vector<128x130xf32>
    %90 = tpu.iota {dimensions = array<i32: 1>} : vector<128x130xi32>
    %c0_i32 = arith.constant 0 : i32
    %91 = vector.broadcast %c0_i32 : i32 to vector<128x130xi32>
    %92 = arith.cmpi eq, %90, %91 : vector<128x130xi32>
    %c129_i32 = arith.constant 129 : i32
    %93 = vector.broadcast %c129_i32 : i32 to vector<128x130xi32>
    %94 = arith.cmpi eq, %90, %93 : vector<128x130xi32>
    %95 = arith.ori %92, %94 : vector<128x130xi1>
    %96 = vector.shape_cast %80 : vector<1x130xf32> to vector<1x130xf32>
    %97 = vector.broadcast %96 : vector<1x130xf32> to vector<128x130xf32>
    %98 = arith.select %95, %97, %89 : vector<128x130xi1>, vector<128x130xf32>
    %c0_38 = arith.constant 0 : index
    %c0_39 = arith.constant 0 : index
    %99 = vector.load %arg3[%c0_38, %c0_39] : memref<130x130xf32, #tpu.memory_space<vmem>>, vector<1x130xf32>
    tpu.vector_store %arg3[%c0_38, %c0_39], %80 {strides = array<i32>} : memref<130x130xf32, #tpu.memory_space<vmem>>, vector<1x130xf32>,
    %c129 = arith.constant 129 : index
    %c0_40 = arith.constant 0 : index
    %100 = vector.load %arg3[%c129, %c0_40] : memref<130x130xf32, #tpu.memory_space<vmem>>, vector<1x130xf32>
    tpu.vector_store %arg3[%c129, %c0_40], %80 {strides = array<i32>} : memref<130x130xf32, #tpu.memory_space<vmem>>, vector<1x130xf32>,
    %c1_41 = arith.constant 1 : index
    %c0_42 = arith.constant 0 : index
    %101 = vector.load %arg3[%c1_41, %c0_42] : memref<130x130xf32, #tpu.memory_space<vmem>>, vector<128x130xf32>
    tpu.vector_store %arg3[%c1_41, %c0_42], %98 {strides = array<i32>} : memref<130x130xf32, #tpu.memory_space<vmem>>, vector<128x130xf32>,
    return
  }
}

</mosaic_0001>

<bundles_post_ra>
// kernel: model_forward.1
= control target key start
LH: loop header
LB: loop body
LE: loop exit
PB: predicated region body
PF: predicated region fallthrough
CT: control target
= control target key end

     0   :  { %9 = vsyncpa [#allocation5], 0  ;;  %s4151_s0 = inlined_call_operand.vmem [shape: f32[9], index: 0, kind: input, shape index: {}]   ;;  %s4152_s1 = inlined_call_operand.<no memory space> [shape: f32[1], index: 1, kind: input, shape index: {}]   ;;  %s4153_s2 = inlined_call_operand.hbm [shape: f32[9,128,128], index: 2, kind: input, shape index: {}]   ;;  %s4154_s3 = inlined_call_operand.vmem [shape: f32[130,130], index: 3, kind: output, shape index: {}]  }
   0x1   :  { %s17_s14 = sshll.u32 %s4151_s0, 4  ;;  %s18_s14 = int_to_ptr.vmem [resolvable:$true] %s17_s14 }
   0x2   :  { %10 = vsyncpa [#allocation4], 0  ;;  %s2771_s15 = scalar_lea.vmem %s18_s14, 16  ;;  %p2776_p1 = scmp.lt.s32.totalorder %s18_s14, %s18_s14 }
   0x3   :  { %p2772_p0 = scmp.ne.s32.totalorder %s18_s14, %s2771_s15  ;;  %p2777_p2 = scmp.lt.s32.totalorder %s2771_s15, %s2771_s15 }
   0x5   :  { %p2778_p3 = por %p2777_p2, %p2776_p1 }
   0x7   :  { %p2779_p4 = pnand %p2778_p3, %p2772_p0 }
   0x9   :  { %2782 = shalt.err (!%p2779_p4)
}
   0xa   :  { %s2809_s16 = smov [#allocation3]   ;;  %s2810_s17 = smov [#allocation6]  }
   0xb   :  { %20 = dma.vmem_to_smem %s18_s14, 16, %s2809_s16, [#allocation5]  }
   0xc   :  { %s28_s18 = sshll.u32 %s2810_s17, 4  ;;  %s2783_s21 = scalar_lea.hbm %s4153_s2, 18432  ;;  %s29_s18 = int_to_ptr.vmem [resolvable:$true] %s28_s18 }
   0xd   :  { %p2784_p5 = scmp.ne.s32.totalorder %s4153_s2, %s2783_s21  ;;  %p2787_p6 = scmp.lt.u32.totalorder %s2783_s21, %s4153_s2 }
   0xf   :  { %p2789_p7 = pnand %p2787_p6, %p2784_p5 }
  0x11   :  { %2792 = shalt.err (!%p2789_p7)
}
  0x12   :  { %s2793_s25 = scalar_lea.vmem %s29_s18, 18432  ;;  %p2798_p9 = scmp.lt.s32.totalorder %s29_s18, %s29_s18 }
  0x13   :  { %p2794_p8 = scmp.ne.s32.totalorder %s29_s18, %s2793_s25  ;;  %p2799_p10 = scmp.lt.s32.totalorder %s2793_s25, %s2793_s25 }
  0x15   :  { %p2800_p11 = por %p2799_p10, %p2798_p9 }
  0x17   :  { %p2801_p12 = pnand %p2800_p11, %p2794_p8 }
  0x19   :  { %2804 = shalt.err (!%p2801_p12)
}
  0x1a   :  { %s2811_s26 = smov 128   ;;  %s2812_s27 = smov 8  }
  0x1b   :  { %34 = dma.hbm_to_vmem [thread:$0]  %s4153_s2, 18432, %s29_s18, [#allocation4], %s2811_s26, %s2811_s26, %s2812_s27  }
  0x1c   :  { %2805 = dma.done.wait [#allocation5], 16  }
  0x1d   :  { %2806 = vsyncadd [#allocation5], 4294967280 }
  0x1e   :  { %2807 = dma.done.wait [#allocation4], 18432  }
  0x1f   :  { %2808 = vsyncadd [#allocation4], 4294948864 }
  0x20   :  { %41 = sfence }
  0x21   :  { %v2856_v0 = vstv %s4152_s1  ;;  %v638_v1 = vlaneseq  ;;  %v4159_v2 = vmov 0.0|0.0   ;;  %v4155_v6 = vmov 0.0   ;;  %s3001_s1 = sld [smem:[#allocation3]]  ;;  %s3016_s2 = sld [smem:[#allocation3 + $0x1]]  ;;  %v131_v54 = vld [vmem:[#allocation6 + $0x108] sm:$0xff] }
  0x22   :  { %2491 = vmatprep.subr.bf16.mxu0 %v4159_v2  ;;  %v630_v3 = vmul.f32 %v2856_v0, %v2856_v0  ;;  %2415 = vmatprep.subr.bf16.mxu1 %v4159_v2  ;;  %v4196_v25 = vmov 0  ;;  %v4161_v30 = vmov 1.0|1.0   ;;  %v4200_v32 = vmov 0  ;;  %s3036_s5 = sld [smem:[#allocation3 + $0x2]]  ;;  %s3038_s6 = sld [smem:[#allocation3 + $0x3]] }
  0x23   :  { %v2863_v4 = vshrl.u32 %v638_v1, 7  ;;  %v2866_v5 = vand.u32 127, %v638_v1  ;;  %1573 = vmatprep.mubr.f32.mxu0 %v4155_v6  ;;  %802 = vmatprep.mubr.f32.mxu1 %v4155_v6  ;;  %v2816_v41 = vmov 1.0   ;;  %vm2943_vm9 = vcmp.lt.s32.totalorder %v638_v1, 130  ;;  %s3060_s7 = sld [smem:[#allocation3 + $0x4]]  ;;  %s3062_s8 = sld [smem:[#allocation3 + $0x5]] }
  0x24   :  { %v631_v7 = vmul.f32 0.035677407, %v630_v3  ;;  %v2925_v42 = vpack.c.bf16 %v2816_v41, %v4155_v6  ;;  %v4207_v47 = vmov 0  ;;  %s3088_s13 = sld [smem:[#allocation3 + $0x6]]  ;;  %s3105_s14 = sld [smem:[#allocation3 + $0x7]]  ;;  %v96_v3 = vld [vmem:[#allocation6 + $0x88] sm:$0xff] }
  0x25   :  { %4195 = vst [vmem:[#allocation9_spill] sm:$0xff] %v2866_v5  ;;  %v640_v8 = vadd.s32 8, %v2863_v4  ;;  %v658_v9 = vadd.s32 1, %v2863_v4  ;;  %v641_v10 = vadd.s32 16, %v2863_v4  ;;  %v642_v11 = vadd.s32 24, %v2863_v4  ;;  %s3113_s15 = sld [smem:[#allocation3 + $0x8]] }
  0x26   :  { %v632_v12 = vadd.f32 0.7978846, %v631_v7  ;;  %v643_v13 = vadd.s32 32, %v2863_v4  ;;  %v644_v14 = vadd.s32 40, %v2863_v4  ;;  %v645_v15 = vadd.s32 48, %v2863_v4  ;;  %4204 = vst [vmem:[#allocation14_spill] sm:$0xff] %v2925_v42 }
  0x27   :  { %v659_v16 = vadd.s32 1, %v640_v8  ;;  %vm674_vm0 = vcmp.eq.s32.totalorder %v2866_v5, %v658_v9  ;;  %v660_v17 = vadd.s32 1, %v641_v10  ;;  %v661_v18 = vadd.s32 1, %v642_v11  ;;  %v182_v44 = vld [vmem:[#allocation6 + $0x188] sm:$0xff] }
  0x28   :  { %v633_v19 = vmul.f32 %v632_v12, %v2856_v0  ;;  %v706_v20 = vsel %vm674_vm0, 1.0, %v4155_v6  ;;  %v662_v21 = vadd.s32 1, %v643_v13  ;;  %v663_v22 = vadd.s32 1, %v644_v14  ;;  %v385_v12 = vld [vmem:[#allocation6 + $0x380] sm:$0xff] }
  0x29   :  { %vm676_vm1 = vcmp.eq.s32.totalorder %v2866_v5, %v659_v16  ;;  %v2881_v23 = vsub.f32 %v706_v20, %v706_v20  ;;  %vm678_vm2 = vcmp.eq.s32.totalorder %v2866_v5, %v660_v17  ;;  %vm680_vm3 = vcmp.eq.s32.totalorder %v2866_v5, %v661_v18 }
  0x2a   :  { %2737 = vtanh.f32 %v633_v19  ;;  %v708_v24 = vsel %vm676_vm1, 1.0, %v4155_v6  ;;  %vm2886_vm4 = vmpackc.low %vm676_vm1, %vm674_vm0  ;;  %v710_v26 = vsel %vm678_vm2, 1.0, %v4155_v6  ;;  %v712_v27 = vsel %vm680_vm3, 1.0, %v4155_v6 }
  0x2b   :  { %v4197_v25 = vsel %vm2886_vm4, 4294967295, %v4196_v25  ;;  %v4158_v28 = vand.u32 4294901760, %v2881_v23  ;;  %v2893_v29 = vsub.f32 %v708_v24, %v708_v24  ;;  %2493 = vmatpush1.bf16.msk.msra.mxu0 %vm2886_vm4, %v4161_v30  ;;  %2417 = vmatpush1.bf16.msk.msra.mxu1 %vm2886_vm4, %v4161_v30  ;;  %v2901_v31 = vsub.f32 %v710_v26, %v710_v26  ;;  %vm2904_vm5 = vmpackc.low %vm680_vm3, %vm678_vm2 }
  0x2c   :  { %4198 = vst [vmem:[#allocation10_spill] sm:$0xff] %v4197_v25  ;;  %2494 = vmatprep.subr.bf16.mxu0 %v4159_v2  ;;  %v4201_v32 = vsel %vm2904_vm5, 4294967295, %v4200_v32  ;;  %v2908_v33 = vsub.f32 %v712_v27, %v712_v27  ;;  %2418 = vmatprep.subr.bf16.mxu1 %v4159_v2  ;;  %v646_v34 = vadd.s32 56, %v2863_v4  ;;  %v664_v35 = vadd.s32 1, %v645_v15 }
  0x2d   :  { %4199 = vst [vmem:[#allocation11_spill] sm:$0xff] %v2901_v31  ;;  %4202 = vst [vmem:[#allocation12_spill] sm:$0xff] %v4201_v32  ;;  %v2915_v36 = vsub.f32 %v2881_v23, %v4158_v28  ;;  %v4157_v37 = vand.u32 4294901760, %v2893_v29  ;;  %vm682_vm6 = vcmp.eq.s32.totalorder %v2866_v5, %v662_v21  ;;  %vm684_vm7 = vcmp.eq.s32.totalorder %v2866_v5, %v663_v22  ;;  %v233_v28 = vld [vmem:[#allocation6 + $0x208] sm:$0xff] }
  0x2e   :  { %4203 = vst [vmem:[#allocation13_spill] sm:$0xff] %v2908_v33  ;;  %v714_v38 = vsel %vm682_vm6, 1.0, %v4155_v6  ;;  %v716_v39 = vsel %vm684_vm7, 1.0, %v4155_v6  ;;  %v665_v40 = vadd.s32 1, %v646_v34  ;;  %vm686_vm8 = vcmp.eq.s32.totalorder %v2866_v5, %v664_v35  ;;  %vm2950_vm10 = vmpackc.low %vm684_vm7, %vm682_vm6 }
  0x2f   :  { %v2930_v43 = vsub.f32 %v2893_v29, %v4157_v37  ;;  %2496 = vmatpush1.bf16.msk.msra.mxu0 %vm2904_vm5, %v4161_v30  ;;  %2420 = vmatpush1.bf16.msk.msra.mxu1 %vm2904_vm5, %v4161_v30  ;;  %v2939_v45 = vsub.f32 %v714_v38, %v714_v38  ;;  %v4208_v47 = vsel %vm2950_vm10, 4294967295, %v4207_v47  ;;  %v2954_v48 = vsub.f32 %v716_v39, %v716_v39 }
  0x30   :  { %2497 = vmatprep.subr.bf16.mxu0 %v4159_v2  ;;  %4209 = vst [vmem:[#allocation15_spill] sm:$0xff] %v4208_v47  ;;  %2421 = vmatprep.subr.bf16.mxu1 %v4159_v2  ;;  %v718_v49 = vsel %vm686_vm8, 1.0, %v4155_v6  ;;  %v647_v50 = vadd.s32 64, %v2863_v4  ;;  %v648_v51 = vadd.s32 72, %v2863_v4  ;;  %v987_v52 = vand.u32 4294901760, %v2915_v36 }
  0x31   :  { %v997_v53 = vand.u32 4294901760, %v2930_v43  ;;  %vm688_vm11 = vcmp.eq.s32.totalorder %v2866_v5, %v665_v40  ;;  %v2969_v56 = vsub.f32 %v718_v49, %v718_v49  ;;  %v649_v59 = vadd.s32 80, %v2863_v4 }
  0x32   :  { %v720_v55 = vsel %vm688_vm11, 1.0, %v4155_v6  ;;  %v666_v57 = vadd.s32 1, %v647_v50  ;;  %v667_v58 = vadd.s32 1, %v648_v51  ;;  %v650_v60 = vadd.s32 88, %v2863_v4  ;;  %vm2988_vm12 = vmpackc.low %vm688_vm11, %vm686_vm8 }
  0x33   :  { %2499 = vmatpush1.bf16.msk.msra.mxu0 %vm2950_vm10, %v4161_v30  ;;  %2423 = vmatpush1.bf16.msk.msra.mxu1 %vm2950_vm10, %v4161_v30  ;;  %v651_v61 = vadd.s32 96, %v2863_v4  ;;  %v652_v62 = vadd.s32 104, %v2863_v4  ;;  %v4210_v7 = vmov 0  ;;  %v668_v11 = vadd.s32 1, %v649_v59 }
  0x34   :  { %v2738_v63 = vpop.eup %2737  ;;  %2500 = vmatprep.subr.bf16.mxu0 %v4159_v2  ;;  %v4211_v7 = vsel %vm2988_vm12, 4294967295, %v4210_v7  ;;  %2424 = vmatprep.subr.bf16.mxu1 %v4159_v2  ;;  %vm690_vm13 = vcmp.eq.s32.totalorder %v2866_v5, %v666_v57  ;;  %vm692_vm14 = vcmp.eq.s32.totalorder %v2866_v5, %v667_v58  ;;  %v3004_v13 = vsub.f32 %v720_v55, %v720_v55  ;;  %v44_v58 = vld [vmem:[#allocation6] sm:$0xff] }
  0x35   :  { %4212 = vst [vmem:[#allocation16_spill] sm:$0xff] %v4211_v7  ;;  %v635_v8 = vmul.f32 0.5, %v2738_v63  ;;  %v722_v9 = vsel %vm690_vm13, 1.0, %v4155_v6  ;;  %v724_v10 = vsel %vm692_vm14, 1.0, %v4155_v6  ;;  %v669_v14 = vadd.s32 1, %v650_v60  ;;  %vm3023_vm0 = vmpackc.low %vm692_vm14, %vm690_vm13  ;;  %v334_v60 = vld [vmem:[#allocation6 + $0x300] sm:$0xff] }
  0x36   :  { %v3006_v15 = vadd.s32 1, %v651_v61  ;;  %vm694_vm15 = vcmp.eq.s32.totalorder %v2866_v5, %v668_v11  ;;  %v671_v17 = vadd.s32 1, %v652_v62  ;;  %v654_v18 = vadd.s32 120, %v2863_v4  ;;  %v95_v62 = vld [vmem:[#allocation6 + $0x80] sm:$0xff] }
  0x37   :  { %v636_v16 = vadd.f32 0.5, %v635_v8  ;;  %2502 = vmatpush1.bf16.msk.msra.mxu0 %vm2988_vm12, %v4161_v30  ;;  %2426 = vmatpush1.bf16.msk.msra.mxu1 %vm2988_vm12, %v4161_v30  ;;  %v4213_v19 = vmov 0  ;;  %v3027_v20 = vsub.f32 %v722_v9, %v722_v9  ;;  %v3029_v21 = vsub.f32 %v724_v10, %v724_v10  ;;  %v130_v9 = vld [vmem:[#allocation6 + $0x100] sm:$0xff] }
  0x38   :  { %2503 = vmatprep.subr.bf16.mxu0 %v4159_v2  ;;  %v4214_v19 = vsel %vm3023_vm0, 4294967295, %v4213_v19  ;;  %2427 = vmatprep.subr.bf16.mxu1 %v4159_v2  ;;  %vm696_vm1 = vcmp.eq.s32.totalorder %v2866_v5, %v669_v14  ;;  %v726_v22 = vsel %vm694_vm15, 1.0, %v4155_v6  ;;  %vm698_vm2 = vcmp.eq.s32.totalorder %v2866_v5, %v3006_v15  ;;  %v283_v15 = vld [vmem:[#allocation6 + $0x280] sm:$0xff] }
  0x39   :  { %4215 = vst [vmem:[#allocation17_spill] sm:$0xff] %v4214_v19  ;;  %4216 = vst [vmem:[#allocation18_spill] sm:$0xff] %v3027_v20  ;;  %v3041_v24 = vmul.f32 %v636_v16, %v2856_v0  ;;  %v728_v26 = vsel %vm696_vm1, 1.0, %v4155_v6  ;;  %v3046_v27 = vsub.f32 %v726_v22, %v726_v22  ;;  %vm700_vm3 = vcmp.eq.s32.totalorder %v2866_v5, %v671_v17 }
  0x3a   :  { %4217 = vst [vmem:[#allocation19_spill] sm:$0xff] %v3029_v21  ;;  %v3050_v34 = vsub.f32 %v728_v26, %v728_v26  ;;  %v730_v35 = vsel %vm698_vm2, 1.0, %v4155_v6  ;;  %v3058_v38 = vadd.s32 128, %v2866_v5  ;;  %v732_v40 = vsel %vm700_vm3, 1.0, %v4155_v6  ;;  %vm3097_vm6 = vmpackc.low %vm696_vm1, %vm694_vm15 }
  0x3b   :  { %4218 = vst [vmem:[#allocation20_spill] sm:$0xff] %v3041_v24  ;;  %2178 = vst.msk [vmem:[%s4154_s3] ss:$8 sm:$0x3] %vm2943_vm9, %v3041_v24  ;;  %2505 = vmatpush1.bf16.msk.msra.mxu0 %vm3023_vm0, %v4161_v30  ;;  %2429 = vmatpush1.bf16.msk.msra.mxu1 %vm3023_vm0, %v4161_v30  ;;  %v3086_v41 = vsub.f32 %v730_v35, %v730_v35  ;;  %v673_v46 = vadd.s32 1, %v654_v18  ;;  %v4220_v51 = vmov 0  ;;  %v3102_v55 = vsub.f32 %v732_v40, %v732_v40 }
  0x3c   :  { %4219 = vst [vmem:[#allocation21_spill] sm:$0xff] %v3058_v38  ;;  %2414 = vst.msk [vmem:[%s4154_s3 + $0x101] ss:$8 sm:$0x3] %vm2943_vm9, %v3041_v24  ;;  %2506 = vmatprep.subr.bf16.mxu0 %v4159_v2  ;;  %v4221_v51 = vsel %vm3097_vm6, 4294967295, %v4220_v51  ;;  %2430 = vmatprep.subr.bf16.mxu1 %v4159_v2  ;;  %v653_v57 = vadd.s32 112, %v2863_v4  ;;  %v3111_v61 = vstv %s3001_s1  ;;  %v3132_v16 = vstv %s3016_s2 }
  0x3d   :  { %4222 = vst [vmem:[#allocation22_spill] sm:$0xff] %v4221_v51  ;;  %vm705_vm7 = vcmp.eq.s32.totalorder %v3058_v38, %v673_v46  ;;  %vm704_vm8 = vcmp.eq.s32.totalorder %v2866_v5, %v673_v46  ;;  %v62_v14 = vmul.f32 %v3111_v61, %v44_v58  ;;  %v181_v18 = vld [vmem:[#allocation6 + $0x180] sm:$0xff]  ;;  %vm3140_vm9 = vmpackc.low %vm700_vm3, %vm698_vm2  ;;  %v4223_v22 = vmov 0  ;;  %v46_v24 = vld [vmem:[#allocation6 + $0x10] sm:$0xff] }
  0x3e   :  { %v737_v4 = vsel %vm705_vm7, 1.0, %v4155_v6  ;;  %v672_v8 = vadd.s32 1, %v653_v57  ;;  %v736_v11 = vsel %vm704_vm8, 1.0, %v4155_v6  ;;  %v4224_v22 = vsel %vm3140_vm9, 4294967295, %v4223_v22  ;;  %v232_v57 = vld [vmem:[#allocation6 + $0x200] sm:$0xff]  ;;  %v97_v38 = vld [vmem:[#allocation6 + $0x90] sm:$0xff] }
  0x3f   :  { %2508 = vmatpush1.bf16.msk.msra.mxu0 %vm3097_vm6, %v4161_v30  ;;  %2432 = vmatpush1.bf16.msk.msra.mxu1 %vm3097_vm6, %v4161_v30  ;;  %4225 = vst [vmem:[#allocation23_spill] sm:$0xff] %v4224_v22  ;;  %v113_v26 = vmul.f32 %v3132_v16, %v95_v62  ;;  %v3148_v35 = vstv %s3036_s5  ;;  %v3151_v40 = vstv %s3038_s6  ;;  %vm2817_vm13 = vmmov 1   ;;  %v438_v51 = vld [vmem:[#allocation6 + $0x410] sm:$0xff] }
  0x40   :  { %2509 = vmatprep.subr.bf16.mxu0 %v4159_v2  ;;  %2433 = vmatprep.subr.bf16.mxu1 %v4159_v2  ;;  %vm702_vm11 = vcmp.eq.s32.totalorder %v2866_v5, %v672_v8  ;;  %vm3155_vm14 = vmpackc.low %vm705_vm7, %vm2817_vm13  ;;  %v4226_v17 = vmov 0  ;;  %v3159_v58 = vsub.f32 %v737_v4, %v737_v4  ;;  %v78_v10 = vadd.f32 %v62_v14, %v2856_v0  ;;  %v132_v5 = vld [vmem:[#allocation6 + $0x110] sm:$0xff] }
  0x41   :  { %v4227_v17 = vsel %vm3155_vm14, 4294967295, %v4226_v17  ;;  %v734_v62 = vsel %vm702_vm11, 1.0, %v4155_v6  ;;  %v148_v63 = vmul.f32 %v3148_v35, %v130_v9  ;;  %v3166_v59 = vsub.f32 %v736_v11, %v736_v11  ;;  %v45_v6 = vld [vmem:[#allocation6 + $0x8] sm:$0xff]  ;;  %vm3193_vm15 = vmpackc.low %vm704_vm8, %vm702_vm11 }
  0x42   :  { %4228 = vst [vmem:[#allocation24_spill] sm:$0xff] %v4227_v17  ;;  %v199_v50 = vmul.f32 %v3151_v40, %v181_v18  ;;  %v3170_v49 = vstv %s3060_s7  ;;  %v3173_v39 = vstv %s3062_s8  ;;  %v3184_v14 = vstv %s3088_s13  ;;  %v436_v18 = vld [vmem:[#allocation6 + $0x400] sm:$0xff] }
  0x43   :  { %2511 = vmatpush1.bf16.msk.msra.mxu0 %vm3140_vm9, %v4161_v30  ;;  %2435 = vmatpush1.bf16.msk.msra.mxu1 %vm3140_vm9, %v4161_v30  ;;  %v164_v4 = vadd.f32 %v148_v63, %v78_v10  ;;  %v250_v9 = vmul.f32 %v3170_v49, %v232_v57  ;;  %v301_v11 = vmul.f32 %v3173_v39, %v283_v15  ;;  %v4229_v63 = vmov 0  ;;  %v284_v30 = vld [vmem:[#allocation6 + $0x288] sm:$0xff] }
  0x44   :  { %2514 = vmatprep.subr.msk.bf16.mxu0 %vm3155_vm14, %v2925_v42  ;;  %v4230_v63 = vsel %vm3193_vm15, 4294967295, %v4229_v63  ;;  %v3197_v10 = vsub.f32 %v734_v62, %v734_v62  ;;  %2438 = vmatprep.subr.msk.bf16.mxu1 %vm3155_vm14, %v2925_v42  ;;  %v215_v57 = vadd.f32 %v199_v50, %v113_v26  ;;  %v352_v15 = vmul.f32 %v3184_v14, %v334_v60 }
  0x45   :  { %4231 = vst [vmem:[#allocation25_spill] sm:$0xff] %v4230_v63  ;;  %v3204_v1 = vstv %s3105_s14  ;;  %v266_v8 = vadd.f32 %v250_v9, %v164_v4  ;;  %v3208_v37 = vstv %s3113_s15  ;;  %v3214_v62 = vpack.c.bf16 %v997_v53, %v987_v52  ;;  %v335_v4 = vld [vmem:[#allocation6 + $0x308] sm:$0xff]  ;;  %v183_v63 = vld [vmem:[#allocation6 + $0x190] sm:$0xff] }
  0x46   :  { %v403_v46 = vmul.f32 %v3204_v1, %v385_v12  ;;  %v317_v2 = vadd.f32 %v301_v11, %v215_v57  ;;  %v454_v50 = vmul.f32 %v3208_v37, %v436_v18  ;;  %v63_v60 = vmul.f32 %v3111_v61, %v45_v6  ;;  %v386_v6 = vld [vmem:[#allocation6 + $0x388] sm:$0xff] }
  0x47   :  { %v114_v26 = vmul.f32 %v3132_v16, %v96_v3  ;;  %v4232_v9 = vmov 1.0|1.0   ;;  %v368_v36 = vadd.f32 %v352_v15, %v266_v8  ;;  %v149_v43 = vmul.f32 %v3148_v35, %v131_v54  ;;  %v437_v53 = vld [vmem:[#allocation6 + $0x408] sm:$0xff]  ;;  %v234_v3 = vld [vmem:[#allocation6 + $0x210] sm:$0xff] }
  0x48   :  { %2516 = vmatpush1.bf16.msk.msra.mxu0 %vm3193_vm15, %v4232_v9  ;;  %2440 = vmatpush1.bf16.msk.msra.mxu1 %vm3193_vm15, %v4232_v9  ;;  %v200_v52 = vmul.f32 %v3151_v40, %v182_v44  ;;  %v419_v11 = vadd.f32 %v403_v46, %v317_v2  ;;  %v4233_v18 = vmov 0.0|0.0   ;;  %v79_v57 = vadd.f32 %v63_v60, %v2856_v0 }
  0x49   :  { %2441 = vmatprep.subr.bf16.mxu1 %v4233_v18  ;;  %2517 = vmatprep.subr.bf16.mxu0 %v4233_v18  ;;  %v251_v12 = vmul.f32 %v3170_v49, %v233_v28  ;;  %v470_v15 = vadd.f32 %v454_v50, %v368_v36  ;;  %v302_v54 = vmul.f32 %v3173_v39, %v284_v30  ;;  %v4234_v60 = vand.u32 4294901760, %v2881_v23  ;;  %v285_v50 = vld [vmem:[#allocation6 + $0x290] sm:$0xff] }
  0x4a   :  { %v216_v8 = vadd.f32 %v200_v52, %v114_v26  ;;  %v353_v44 = vmul.f32 %v3184_v14, %v335_v4  ;;  %v165_v2 = vadd.f32 %v149_v43, %v79_v57  ;;  %v404_v46 = vmul.f32 %v3204_v1, %v386_v6  ;;  %v336_v52 = vld [vmem:[#allocation6 + $0x310] sm:$0xff] }
  0x4b   :  { %v455_v17 = vmul.f32 %v3208_v37, %v437_v53  ;;  %v4235_v28 = vand.u32 4294901760, %v2893_v29  ;;  %v3243_v26 = vadd.f32 %v470_v15, %v419_v11  ;;  %v64_v4 = vmul.f32 %v3111_v61, %v46_v24  ;;  %v387_v43 = vld [vmem:[#allocation6 + $0x390] sm:$0xff] }
  0x4c   :  { %v318_v30 = vadd.f32 %v302_v54, %v216_v8  ;;  %v115_v36 = vmul.f32 %v3132_v16, %v97_v38  ;;  %v267_v57 = vadd.f32 %v251_v12, %v165_v2  ;;  %v150_v6 = vmul.f32 %v3148_v35, %v132_v5  ;;  %v47_v8 = vld [vmem:[#allocation6 + $0x18] sm:$0xff] }
  0x4d   :  { %v3241_v42 = vpack.c.bf16 %v4235_v28, %v4234_v60  ;;  %v201_v53 = vmul.f32 %v3151_v40, %v183_v63  ;;  %v252_v22 = vmul.f32 %v3170_v49, %v234_v3  ;;  %v502_v60 = vmul.f32 %v3243_v26, %v3243_v26  ;;  %v98_v2 = vld [vmem:[#allocation6 + $0x98] sm:$0xff] }
  0x4e   :  { %v420_v11 = vadd.f32 %v404_v46, %v318_v30  ;;  %v80_v15 = vadd.f32 %v64_v4, %v2856_v0  ;;  %v303_v24 = vmul.f32 %v3173_v39, %v285_v50  ;;  %v369_v38 = vadd.f32 %v353_v44, %v267_v57  ;;  %v184_v57 = vld [vmem:[#allocation6 + $0x198] sm:$0xff] }
  0x4f   :  { %v217_v54 = vadd.f32 %v201_v53, %v115_v36  ;;  %v354_v12 = vmul.f32 %v3184_v14, %v336_v52  ;;  %v405_v5 = vmul.f32 %v3204_v1, %v387_v43  ;;  %v518_v63 = vmul.f32 0.035677407, %v502_v60  ;;  %v133_v52 = vld [vmem:[#allocation6 + $0x118] sm:$0xff] }
  0x50   :  { %v166_v28 = vadd.f32 %v150_v6, %v80_v15  ;;  %v456_v3 = vmul.f32 %v3208_v37, %v438_v51  ;;  %v4236_v19 = vand.u32 4294901760, %v2901_v31  ;;  %v471_v30 = vadd.f32 %v455_v17, %v369_v38  ;;  %v235_v51 = vld [vmem:[#allocation6 + $0x218] sm:$0xff] }
  0x51   :  { %v319_v4 = vadd.f32 %v303_v24, %v217_v54  ;;  %v4237_v50 = vand.u32 4294901760, %v2908_v33  ;;  %v65_v36 = vmul.f32 %v3111_v61, %v47_v8  ;;  %v534_v43 = vadd.f32 0.7978846, %v518_v63  ;;  %v286_v15 = vld [vmem:[#allocation6 + $0x298] sm:$0xff] }
  0x52   :  { %v1006_v46 = vsub.f32 %v2901_v31, %v4236_v19  ;;  %v268_v53 = vadd.f32 %v252_v22, %v166_v28  ;;  %v116_v6 = vmul.f32 %v3132_v16, %v98_v2  ;;  %v3265_v7 = vadd.f32 %v471_v30, %v420_v11  ;;  %v337_v63 = vld [vmem:[#allocation6 + $0x318] sm:$0xff] }
  0x53   :  { %v1016_v44 = vsub.f32 %v2908_v33, %v4237_v50  ;;  %v421_v19 = vadd.f32 %v405_v5, %v319_v4  ;;  %v81_v24 = vadd.f32 %v65_v36, %v2856_v0  ;;  %v550_v38 = vmul.f32 %v534_v43, %v3243_v26  ;;  %v388_v22 = vld [vmem:[#allocation6 + $0x398] sm:$0xff]  ;;  %v99_v36 = vld [vmem:[#allocation6 + $0xa0] sm:$0xff] }
  0x54   :  { %v1007_v60 = vand.u32 4294901760, %v1006_v46  ;;  %v370_v54 = vadd.f32 %v354_v12, %v268_v53  ;;  %v151_v8 = vmul.f32 %v3148_v35, %v133_v52  ;;  %v202_v50 = vmul.f32 %v3151_v40, %v184_v57  ;;  %v439_v28 = vld [vmem:[#allocation6 + $0x418] sm:$0xff]  ;;  %v134_v52 = vld [vmem:[#allocation6 + $0x120] sm:$0xff] }
  0x55   :  { %v1017_v17 = vand.u32 4294901760, %v1016_v44  ;;  %v503_v2 = vmul.f32 %v3265_v7, %v3265_v7  ;;  %v253_v11 = vmul.f32 %v3170_v49, %v235_v51  ;;  %v304_v5 = vmul.f32 %v3173_v39, %v286_v15  ;;  %v48_v44 = vld [vmem:[#allocation6 + $0x20] sm:$0xff] }
  0x56   :  { %2739 = vtanh.f32 %v550_v38  ;;  %v472_v30 = vadd.f32 %v456_v3, %v370_v54  ;;  %v167_v4 = vadd.f32 %v151_v8, %v81_v24  ;;  %v218_v12 = vadd.f32 %v202_v50, %v116_v6  ;;  %v236_v24 = vld [vmem:[#allocation6 + $0x220] sm:$0xff] }
  0x57   :  { %v3273_v46 = vpack.c.bf16 %v1017_v17, %v1007_v60  ;;  %v519_v57 = vmul.f32 0.035677407, %v503_v2  ;;  %v355_v43 = vmul.f32 %v3184_v14, %v337_v63  ;;  %v406_v53 = vmul.f32 %v3204_v1, %v388_v22  ;;  %v185_v60 = vld [vmem:[#allocation6 + $0x1a0] sm:$0xff] }
  0x58   :  { %v457_v47 = vmul.f32 %v3208_v37, %v439_v28  ;;  %v3280_v17 = vadd.f32 %v472_v30, %v421_v19  ;;  %v269_v51 = vadd.f32 %v253_v11, %v167_v4  ;;  %v320_v32 = vadd.f32 %v304_v5, %v218_v12  ;;  %v287_v38 = vld [vmem:[#allocation6 + $0x2a0] sm:$0xff] }
  0x59   :  { %v4238_v15 = vand.u32 4294901760, %v2901_v31  ;;  %v4239_v3 = vand.u32 4294901760, %v2908_v33  ;;  %v535_v54 = vadd.f32 0.7978846, %v519_v57  ;;  %v66_v8 = vmul.f32 %v3111_v61, %v48_v44  ;;  %v338_v22 = vld [vmem:[#allocation6 + $0x320] sm:$0xff]  ;;  %v49_v33 = vld [vmem:[#allocation6 + $0x28] sm:$0xff] }
  0x5a   :  { %v117_v50 = vmul.f32 %v3132_v16, %v99_v36  ;;  %v152_v63 = vmul.f32 %v3148_v35, %v134_v52  ;;  %v504_v19 = vmul.f32 %v3280_v17, %v3280_v17  ;;  %v371_v28 = vadd.f32 %v355_v43, %v269_v51  ;;  %v389_v5 = vld [vmem:[#allocation6 + $0x3a0] sm:$0xff]  ;;  %v100_v43 = vld [vmem:[#allocation6 + $0xa8] sm:$0xff] }
  0x5b   :  { %v3286_v6 = vpack.c.bf16 %v4239_v3, %v4238_v15  ;;  %v422_v2 = vadd.f32 %v406_v53, %v320_v32  ;;  %v203_v11 = vmul.f32 %v3151_v40, %v185_v60  ;;  %v440_v30 = vld [vmem:[#allocation6 + $0x420] sm:$0xff]  ;;  %v551_v4 = vmul.f32 %v535_v54, %v3265_v7 }
  0x5c   :  { %v82_v12 = vadd.f32 %v66_v8, %v2856_v0  ;;  %v254_v44 = vmul.f32 %v3170_v49, %v236_v24  ;;  %v305_v36 = vmul.f32 %v3173_v39, %v287_v38  ;;  %v520_v57 = vmul.f32 0.035677407, %v504_v19 }
  0x5d   :  { %v473_v52 = vadd.f32 %v457_v47, %v371_v28  ;;  %v219_v15 = vadd.f32 %v203_v11, %v117_v50  ;;  %v356_v3 = vmul.f32 %v3184_v14, %v338_v22  ;;  %2741 = vtanh.f32 %v551_v4  ;;  %v135_v28 = vld [vmem:[#allocation6 + $0x128] sm:$0xff] }
  0x5e   :  { %v168_v32 = vadd.f32 %v152_v63, %v82_v12  ;;  %v407_v53 = vmul.f32 %v3204_v1, %v389_v5  ;;  %v458_v60 = vmul.f32 %v3208_v37, %v440_v30  ;;  %v536_v51 = vadd.f32 0.7978846, %v520_v57  ;;  %v186_v11 = vld [vmem:[#allocation6 + $0x1a8] sm:$0xff] }
  0x5f   :  { %v3301_v54 = vadd.f32 %v473_v52, %v422_v2  ;;  %v321_v8 = vadd.f32 %v305_v36, %v219_v15  ;;  %v4240_v24 = vand.u32 4294901760, %v2939_v45  ;;  %v4241_v50 = vand.u32 4294901760, %v2954_v48  ;;  %v237_v36 = vld [vmem:[#allocation6 + $0x228] sm:$0xff] }
  0x60   :  { %v270_v47 = vadd.f32 %v254_v44, %v168_v32  ;;  %v67_v19 = vmul.f32 %v3111_v61, %v49_v33  ;;  %v118_v63 = vmul.f32 %v3132_v16, %v100_v43  ;;  %v2740_v5 = vpop.eup %2739  ;;  %v552_v2 = vmul.f32 %v536_v51, %v3280_v17  ;;  %v288_v32 = vld [vmem:[#allocation6 + $0x2a8] sm:$0xff] }
  0x61   :  { %v1026_v38 = vsub.f32 %v2939_v45, %v4240_v24  ;;  %v1036_v22 = vsub.f32 %v2954_v48, %v4241_v50  ;;  %v505_v30 = vmul.f32 %v3301_v54, %v3301_v54  ;;  %v423_v4 = vadd.f32 %v407_v53, %v321_v8  ;;  %v339_v50 = vld [vmem:[#allocation6 + $0x328] sm:$0xff] }
  0x62   :  { %v582_v44 = vmul.f32 0.5, %v2740_v5  ;;  %v372_v57 = vadd.f32 %v356_v3, %v270_v47  ;;  %v83_v15 = vadd.f32 %v67_v19, %v2856_v0  ;;  %2743 = vtanh.f32 %v552_v2  ;;  %v390_v51 = vld [vmem:[#allocation6 + $0x3a8] sm:$0xff]  ;;  %v50_v19 = vld [vmem:[#allocation6 + $0x30] sm:$0xff] }
  0x63   :  { %v1027_v12 = vand.u32 4294901760, %v1026_v38  ;;  %v1037_v52 = vand.u32 4294901760, %v1036_v22  ;;  %v521_v33 = vmul.f32 0.035677407, %v505_v30  ;;  %v153_v43 = vmul.f32 %v3148_v35, %v135_v28  ;;  %v441_v8 = vld [vmem:[#allocation6 + $0x428] sm:$0xff] }
  0x64   :  { %v204_v24 = vmul.f32 %v3151_v40, %v186_v11  ;;  %v598_v31 = vadd.f32 0.5, %v582_v44  ;;  %v474_v25 = vadd.f32 %v458_v60, %v372_v57  ;;  %v255_v53 = vmul.f32 %v3170_v49, %v237_v36  ;;  %v101_v44 = vld [vmem:[#allocation6 + $0xb0] sm:$0xff] }
  0x65   :  { %v3317_v9 = vpack.c.bf16 %v1037_v52, %v1027_v12  ;;  %v537_v3 = vadd.f32 0.7978846, %v521_v33  ;;  %v169_v38 = vadd.f32 %v153_v43, %v83_v15  ;;  %v306_v22 = vmul.f32 %v3173_v39, %v288_v32  ;;  %v136_v15 = vld [vmem:[#allocation6 + $0x130] sm:$0xff] }
  0x66   :  { %v220_v47 = vadd.f32 %v204_v24, %v118_v63  ;;  %v614_v5 = vmul.f32 %v598_v31, %v3243_v26  ;;  %v3322_v28 = vadd.f32 %v474_v25, %v423_v4  ;;  %v357_v11 = vmul.f32 %v3184_v14, %v339_v50  ;;  %v187_v32 = vld [vmem:[#allocation6 + $0x1b0] sm:$0xff] }
  0x67   :  { %v408_v2 = vmul.f32 %v3204_v1, %v390_v51  ;;  %v553_v60 = vmul.f32 %v537_v3, %v3301_v54  ;;  %v271_v30 = vadd.f32 %v255_v53, %v169_v38  ;;  %v459_v36 = vmul.f32 %v3208_v37, %v441_v8  ;;  %v2742_v57 = vpop.eup %2741  ;;  %v238_v50 = vld [vmem:[#allocation6 + $0x230] sm:$0xff] }
  0x68   :  { %v322_v12 = vadd.f32 %v306_v22, %v220_v47  ;;  %v3328_v63 = vand.u32 4294901760, %v614_v5  ;;  %v506_v52 = vmul.f32 %v3322_v28, %v3322_v28  ;;  %v4242_v25 = vand.u32 4294901760, %v2939_v45  ;;  %v289_v51 = vld [vmem:[#allocation6 + $0x2b0] sm:$0xff] }
  0x69   :  { %v4243_v31 = vand.u32 4294901760, %v2954_v48  ;;  %v68_v4 = vmul.f32 %v3111_v61, %v50_v19  ;;  %v583_v33 = vmul.f32 0.5, %v2742_v57  ;;  %2745 = vtanh.f32 %v553_v60  ;;  %v340_v57 = vld [vmem:[#allocation6 + $0x330] sm:$0xff] }
  0x6a   :  { %v373_v43 = vadd.f32 %v357_v11, %v271_v30  ;;  %v424_v24 = vadd.f32 %v408_v2, %v322_v12  ;;  %v3340_v53 = vsub.f32 %v614_v5, %v3328_v63  ;;  %v522_v8 = vmul.f32 0.035677407, %v506_v52 }
  0x6b   :  { %v3336_v26 = vpack.c.bf16 %v4243_v31, %v4242_v25  ;;  %v84_v3 = vadd.f32 %v68_v4, %v2856_v0  ;;  %v119_v38 = vmul.f32 %v3132_v16, %v101_v44  ;;  %v599_v47 = vadd.f32 0.5, %v583_v33 }
  0x6c   :  { %4244 = vst [vmem:[#allocation26_spill] sm:$0xff] %v3340_v53  ;;  %v475_v22 = vadd.f32 %v459_v36, %v373_v43  ;;  %v154_v19 = vmul.f32 %v3148_v35, %v136_v15  ;;  %v205_v25 = vmul.f32 %v3151_v40, %v187_v32  ;;  %v805_v11 = vand.u32 4294901760, %v3340_v53  ;;  %v2744_v30 = vpop.eup %2743  ;;  %v391_v36 = vld [vmem:[#allocation6 + $0x3b0] sm:$0xff] }
  0x6d   :  { %v538_v2 = vadd.f32 0.7978846, %v522_v8  ;;  %v256_v60 = vmul.f32 %v3170_v49, %v238_v50  ;;  %v307_v5 = vmul.f32 %v3173_v39, %v289_v51  ;;  %v615_v12 = vmul.f32 %v599_v47, %v3265_v7  ;;  %v442_v43 = vld [vmem:[#allocation6 + $0x430] sm:$0xff] }
  0x6e   :  { %v3350_v52 = vadd.f32 %v475_v22, %v424_v24  ;;  %v170_v44 = vadd.f32 %v154_v19, %v84_v3  ;;  %v221_v31 = vadd.f32 %v205_v25, %v119_v38  ;;  %1577 = vmatmul.mubr.f32.vlgmr.msra.gmra.mrb[0].mxu0 %v805_v11  ;;  %v806_v4 = vsub.f32 %v3340_v53, %v805_v11  ;;  %v51_v22 = vld [vmem:[#allocation6 + $0x38] sm:$0xff] }
  0x6f   :  { %v584_v15 = vmul.f32 0.5, %v2744_v30  ;;  %v554_v32 = vmul.f32 %v538_v2, %v3322_v28  ;;  %v358_v33 = vmul.f32 %v3184_v14, %v340_v57  ;;  %v4245_v50 = vmov 0.0   ;;  %2519 = vmatpush1.bf16.msra.mxu0 %v3241_v42 }
  0x70   :  { %1582 = vmatprep.mubr.f32.mxu0 %v4245_v50  ;;  %v3356_v51 = vand.u32 4294901760, %v615_v12  ;;  %v507_v7 = vmul.f32 %v3350_v52, %v3350_v52  ;;  %v272_v24 = vadd.f32 %v256_v60, %v170_v44  ;;  %v323_v8 = vadd.f32 %v307_v5, %v221_v31  ;;  %2520 = vmatprep.subr.bf16.mxu0 %v4233_v18 }
  0x71   :  { %v807_v3 = vand.u32 4294901760, %v806_v4  ;;  %v600_v38 = vadd.f32 0.5, %v584_v15  ;;  %2747 = vtanh.f32 %v554_v32  ;;  %v409_v47 = vmul.f32 %v3204_v1, %v391_v36 }
  0x72   :  { %v3364_v19 = vsub.f32 %v615_v12, %v3356_v51  ;;  %v523_v25 = vmul.f32 0.035677407, %v507_v7  ;;  %v374_v57 = vadd.f32 %v358_v33, %v272_v24  ;;  %v460_v42 = vmul.f32 %v3208_v37, %v442_v43  ;;  %v102_v7 = vld [vmem:[#allocation6 + $0xb8] sm:$0xff] }
  0x73   :  { %808 = vmatmul.mubr.f32.vlgmr.msra.gmra.mrb[0].mxu1 %v807_v3  ;;  %v616_v11 = vmul.f32 %v600_v38, %v3280_v17  ;;  %v425_v2 = vadd.f32 %v409_v47, %v323_v8  ;;  %v4247_v60 = vand.u32 4294901760, %v2969_v56  ;;  %v4248_v30 = vand.u32 4294901760, %v3004_v13  ;;  %v2746_v31 = vpop.eup %2745  ;;  %2522 = vmatpush1.bf16.msra.mxu0 %v3286_v6  ;;  %v137_v3 = vld [vmem:[#allocation6 + $0x138] sm:$0xff] }
  0x74   :  { %4246 = vst [vmem:[#allocation27_spill] sm:$0xff] %v3364_v19  ;;  %2443 = vmatpush1.bf16.msra.mxu1 %v3214_v62  ;;  %v816_v12 = vand.u32 4294901760, %v3364_v19  ;;  %813 = vmatprep.mubr.f32.mxu1 %v4245_v50  ;;  %v539_v36 = vadd.f32 0.7978846, %v523_v25  ;;  %v476_v4 = vadd.f32 %v460_v42, %v374_v57  ;;  %v69_v17 = vmul.f32 %v3111_v61, %v51_v22  ;;  %v188_v38 = vld [vmem:[#allocation6 + $0x1b8] sm:$0xff] }
  0x75   :  { %v1046_v5 = vsub.f32 %v2969_v56, %v4247_v60  ;;  %v1056_v44 = vsub.f32 %v3004_v13, %v4248_v30  ;;  %v3378_v15 = vand.u32 4294901760, %v616_v11  ;;  %2444 = vmatprep.subr.bf16.mxu1 %v4233_v18  ;;  %v585_v32 = vmul.f32 0.5, %v2746_v31  ;;  %2523 = vmatprep.subr.bf16.mxu0 %v4233_v18  ;;  %v239_v42 = vld [vmem:[#allocation6 + $0x238] sm:$0xff] }
  0x76   :  { %1586 = vmatmul.mubr.f32.gmra.mrb[2].mxu0 %v816_v12  ;;  %v817_v62 = vsub.f32 %v3364_v19, %v816_v12  ;;  %v555_v24 = vmul.f32 %v539_v36, %v3350_v52  ;;  %v3385_v8 = vadd.f32 %v476_v4, %v425_v2  ;;  %v85_v57 = vadd.f32 %v69_v17, %v2856_v0  ;;  %v290_v60 = vld [vmem:[#allocation6 + $0x2b8] sm:$0xff] }
  0x77   :  { %v1047_v33 = vand.u32 4294901760, %v1046_v5  ;;  %v1057_v43 = vand.u32 4294901760, %v1056_v44  ;;  %1591 = vmatprep.mubr.f32.mxu0 %v4245_v50  ;;  %v3390_v6 = vsub.f32 %v616_v11, %v3378_v15  ;;  %v601_v22 = vadd.f32 0.5, %v585_v32  ;;  %v341_v5 = vld [vmem:[#allocation6 + $0x338] sm:$0xff]  ;;  %2525 = vmatpush1.bf16.msra.mxu0 %v3336_v26 }
  0x78   :  { %v818_v30 = vand.u32 4294901760, %v817_v62  ;;  %2446 = vmatpush1.bf16.msra.mxu1 %v3273_v46  ;;  %2749 = vtanh.f32 %v555_v24  ;;  %v508_v2 = vmul.f32 %v3385_v8, %v3385_v8  ;;  %v120_v44 = vmul.f32 %v3132_v16, %v102_v7  ;;  %v392_v4 = vld [vmem:[#allocation6 + $0x3b8] sm:$0xff]  ;;  %2526 = vmatprep.subr.bf16.mxu0 %v4233_v18 }
  0x79   :  { %4249 = vst [vmem:[#allocation28_spill] sm:$0xff] %v3390_v6  ;;  %v2451_v25 = vpack.c.bf16 %v1057_v43, %v1047_v33  ;;  %v827_v31 = vand.u32 4294901760, %v3390_v6  ;;  %v617_v11 = vmul.f32 %v601_v22, %v3301_v54  ;;  %2447 = vmatprep.subr.bf16.mxu1 %v4233_v18  ;;  %v155_v12 = vmul.f32 %v3148_v35, %v137_v3  ;;  %v443_v46 = vld [vmem:[#allocation6 + $0x438] sm:$0xff]  ;;  %v52_v3 = vld [vmem:[#allocation6 + $0x40] sm:$0xff] }
  0x7a   :  { %v206_v36 = vmul.f32 %v3151_v40, %v188_v38  ;;  %819 = vmatmul.mubr.f32.gmra.mrb[2].mxu1 %v818_v30  ;;  %v524_v17 = vmul.f32 0.035677407, %v508_v2  ;;  %v257_v32 = vmul.f32 %v3170_v49, %v239_v42  ;;  %v308_v33 = vmul.f32 %v3173_v39, %v290_v60  ;;  %v294_v19 = vld [vmem:[#allocation6 + $0x2d8] sm:$0xff] }
  0x7b   :  { %v359_v54 = vmul.f32 %v3184_v14, %v341_v5  ;;  %v2748_v43 = vpop.eup %2747  ;;  %1595 = vmatmul.mubr.f32.gmra.mrb[4].mxu0 %v827_v31  ;;  %824 = vmatprep.mubr.f32.mxu1 %v4245_v50  ;;  %v828_v26 = vsub.f32 %v3390_v6, %v827_v31  ;;  %v3409_v7 = vand.u32 4294901760, %v617_v11  ;;  %v171_v62 = vadd.f32 %v155_v12, %v85_v57  ;;  %v103_v5 = vld [vmem:[#allocation6 + $0xc0] sm:$0xff] }
  0x7c   :  { %v222_v24 = vadd.f32 %v206_v36, %v120_v44  ;;  %1600 = vmatprep.mubr.f32.mxu0 %v4245_v50  ;;  %v586_v38 = vmul.f32 0.5, %v2748_v43  ;;  %2449 = vmatpush1.bf16.msra.mxu1 %v3317_v9  ;;  %v540_v22 = vadd.f32 0.7978846, %v524_v17  ;;  %v410_v42 = vmul.f32 %v3204_v1, %v392_v4  ;;  %v138_v31 = vld [vmem:[#allocation6 + $0x140] sm:$0xff] }
  0x7d   :  { %v461_v60 = vmul.f32 %v3208_v37, %v443_v46  ;;  %v829_v30 = vand.u32 4294901760, %v828_v26  ;;  %v3416_v2 = vsub.f32 %v617_v11, %v3409_v7  ;;  %2450 = vmatprep.subr.bf16.mxu1 %v4233_v18  ;;  %v273_v57 = vadd.f32 %v257_v32, %v171_v62  ;;  %v189_v43 = vld [vmem:[#allocation6 + $0x1c0] sm:$0xff] }
  0x7e   :  { %v324_v44 = vadd.f32 %v308_v33, %v222_v24  ;;  %v602_v12 = vadd.f32 0.5, %v586_v38  ;;  %v556_v36 = vmul.f32 %v540_v22, %v3385_v8  ;;  %v4251_v9 = vand.u32 4294901760, %v2969_v56  ;;  %v240_v26 = vld [vmem:[#allocation6 + $0x240] sm:$0xff] }
  0x7f   :  { %4250 = vst [vmem:[#allocation29_spill] sm:$0xff] %v3416_v2  ;;  %v4252_v17 = vand.u32 4294901760, %v3004_v13  ;;  %v70_v46 = vmul.f32 %v3111_v61, %v52_v3  ;;  %830 = vmatmul.mubr.f32.gmra.mrb[4].mxu1 %v829_v30  ;;  %v838_v11 = vand.u32 4294901760, %v3416_v2  ;;  %v375_v47 = vadd.f32 %v359_v54, %v273_v57  ;;  %v291_v33 = vld [vmem:[#allocation6 + $0x2c0] sm:$0xff] }
  0x80   :  { %v426_v6 = vadd.f32 %v410_v42, %v324_v44  ;;  %v121_v32 = vmul.f32 %v3132_v16, %v103_v5  ;;  %v342_v62 = vld [vmem:[#allocation6 + $0x340] sm:$0xff]  ;;  %835 = vmatprep.mubr.f32.mxu1 %v4245_v50  ;;  %v618_v24 = vmul.f32 %v602_v12, %v3322_v28  ;;  %2751 = vtanh.f32 %v556_v36  ;;  %2452 = vmatpush1.bf16.msra.mxu1 %v2451_v25 }
  0x81   :  { %v2527_v4 = vpack.c.bf16 %v4252_v17, %v4251_v9  ;;  %v86_v38 = vadd.f32 %v70_v46, %v2856_v0  ;;  %v156_v3 = vmul.f32 %v3148_v35, %v138_v31  ;;  %1604 = vmatmul.mubr.f32.gmra.mrb[6].mxu0 %v838_v11  ;;  %v839_v22 = vsub.f32 %v3416_v2, %v838_v11  ;;  %v393_v5 = vld [vmem:[#allocation6 + $0x3c0] sm:$0xff]  ;;  %v53_v17 = vld [vmem:[#allocation6 + $0x48] sm:$0xff] }
  0x82   :  { %v477_v30 = vadd.f32 %v461_v60, %v375_v47  ;;  %v207_v54 = vmul.f32 %v3151_v40, %v189_v43  ;;  %v258_v42 = vmul.f32 %v3170_v49, %v240_v26  ;;  %v444_v57 = vld [vmem:[#allocation6 + $0x440] sm:$0xff]  ;;  %v2750_v44 = vpop.eup %2749  ;;  %1609 = vmatprep.mubr.f32.mxu0 %v4245_v50  ;;  %v3435_v28 = vand.u32 4294901760, %v618_v24  ;;  %2453 = vmatprep.subr.bf16.mxu1 %v4233_v18 }
  0x83   :  { %2528 = vmatpush1.bf16.msra.mxu0 %v2527_v4  ;;  %v172_v25 = vadd.f32 %v156_v3, %v86_v38  ;;  %v309_v12 = vmul.f32 %v3173_v39, %v291_v33  ;;  %v360_v31 = vmul.f32 %v3184_v14, %v342_v62  ;;  %v840_v36 = vand.u32 4294901760, %v839_v22 }
  0x84   :  { %v587_v9 = vmul.f32 0.5, %v2750_v44  ;;  %v3439_v47 = vadd.f32 %v477_v30, %v426_v6  ;;  %v223_v60 = vadd.f32 %v207_v54, %v121_v32  ;;  %2529 = vmatprep.subr.bf16.mxu0 %v4233_v18  ;;  %v3444_v46 = vsub.f32 %v618_v24, %v3435_v28  ;;  %v104_v54 = vld [vmem:[#allocation6 + $0xc8] sm:$0xff] }
  0x85   :  { %v274_v43 = vadd.f32 %v258_v42, %v172_v25  ;;  %v411_v4 = vmul.f32 %v3204_v1, %v393_v5  ;;  %v462_v26 = vmul.f32 %v3208_v37, %v444_v57  ;;  %841 = vmatmul.mubr.f32.gmra.mrb[6].mxu1 %v840_v36  ;;  %v4254_v32 = vand.u32 4294901760, %v3027_v20  ;;  %v139_v42 = vld [vmem:[#allocation6 + $0x148] sm:$0xff] }
  0x86   :  { %4253 = vst [vmem:[#allocation30_spill] sm:$0xff] %v3444_v46  ;;  %v603_v11 = vadd.f32 0.5, %v587_v9  ;;  %v509_v6 = vmul.f32 %v3439_v47, %v3439_v47  ;;  %v325_v33 = vadd.f32 %v309_v12, %v223_v60  ;;  %v849_v38 = vand.u32 4294901760, %v3444_v46  ;;  %846 = vmatprep.mubr.f32.mxu1 %v4245_v50  ;;  %v190_v12 = vld [vmem:[#allocation6 + $0x1c8] sm:$0xff] }
  0x87   :  { %v1066_v62 = vsub.f32 %v3027_v20, %v4254_v32  ;;  %v376_v24 = vadd.f32 %v360_v31, %v274_v43  ;;  %v4255_v3 = vand.u32 4294901760, %v3029_v21  ;;  %v71_v30 = vmul.f32 %v3111_v61, %v53_v17 }
  0x88   :  { %v619_v5 = vmul.f32 %v603_v11, %v3350_v52  ;;  %v525_v57 = vmul.f32 0.035677407, %v509_v6  ;;  %v427_v44 = vadd.f32 %v411_v4, %v325_v33  ;;  %1613 = vmatmul.mubr.f32.gmra.mrb[8].mxu0 %v849_v38  ;;  %v850_v36 = vsub.f32 %v3444_v46, %v849_v38  ;;  %v241_v11 = vld [vmem:[#allocation6 + $0x248] sm:$0xff] }
  0x89   :  { %v1076_v22 = vsub.f32 %v3029_v21, %v4255_v3  ;;  %v1067_v25 = vand.u32 4294901760, %v1066_v62  ;;  %v478_v9 = vadd.f32 %v462_v26, %v376_v24  ;;  %v87_v31 = vadd.f32 %v71_v30, %v2856_v0  ;;  %1618 = vmatprep.mubr.f32.mxu0 %v4245_v50  ;;  %v292_v4 = vld [vmem:[#allocation6 + $0x2c8] sm:$0xff] }
  0x8a   :  { %v3463_v43 = vand.u32 4294901760, %v619_v5  ;;  %v541_v17 = vadd.f32 0.7978846, %v525_v57  ;;  %v122_v32 = vmul.f32 %v3132_v16, %v104_v54  ;;  %v157_v52 = vmul.f32 %v3148_v35, %v139_v42  ;;  %v2752_v6 = vpop.eup %2751  ;;  %v343_v24 = vld [vmem:[#allocation6 + $0x348] sm:$0xff] }
  0x8b   :  { %v1077_v60 = vand.u32 4294901760, %v1076_v22  ;;  %v851_v33 = vand.u32 4294901760, %v850_v36  ;;  %v3467_v62 = vadd.f32 %v478_v9, %v427_v44  ;;  %v208_v26 = vmul.f32 %v3151_v40, %v190_v12  ;;  %v394_v54 = vld [vmem:[#allocation6 + $0x3c8] sm:$0xff] }
  0x8c   :  { %4256 = vst [vmem:[#allocation31_spill] sm:$0xff] %v3463_v43  ;;  %v3471_v3 = vsub.f32 %v619_v5, %v3463_v43  ;;  %v588_v22 = vmul.f32 0.5, %v2752_v6  ;;  %v557_v30 = vmul.f32 %v541_v17, %v3439_v47  ;;  %v173_v57 = vadd.f32 %v157_v52, %v87_v31  ;;  %v445_v36 = vld [vmem:[#allocation6 + $0x448] sm:$0xff]  ;;  %v105_v6 = vld [vmem:[#allocation6 + $0xd0] sm:$0xff]  ;;  %v345_v43 = vld [vmem:[#allocation6 + $0x358] sm:$0xff] }
  0x8d   :  { %v2454_v38 = vpack.c.bf16 %v1077_v60, %v1067_v25  ;;  %852 = vmatmul.mubr.f32.gmra.mrb[8].mxu1 %v851_v33  ;;  %v510_v42 = vmul.f32 %v3467_v62, %v3467_v62  ;;  %v224_v46 = vadd.f32 %v208_v26, %v122_v32  ;;  %v259_v44 = vmul.f32 %v3170_v49, %v241_v11  ;;  %v54_v60 = vld [vmem:[#allocation6 + $0x50] sm:$0xff] }
  0x8e   :  { %4257 = vst [vmem:[#allocation32_spill] sm:$0xff] %v3471_v3  ;;  %v310_v25 = vmul.f32 %v3173_v39, %v292_v4  ;;  %v860_v12 = vand.u32 4294901760, %v3471_v3  ;;  %857 = vmatprep.mubr.f32.mxu1 %v4245_v50  ;;  %v604_v5 = vadd.f32 0.5, %v588_v22  ;;  %2753 = vtanh.f32 %v557_v30  ;;  %v140_v11 = vld [vmem:[#allocation6 + $0x150] sm:$0xff] }
  0x8f   :  { %2455 = vmatpush1.bf16.msra.mxu1 %v2454_v38  ;;  %v361_v9 = vmul.f32 %v3184_v14, %v343_v24  ;;  %v526_v31 = vmul.f32 0.035677407, %v510_v42  ;;  %v275_v17 = vadd.f32 %v259_v44, %v173_v57  ;;  %v412_v32 = vmul.f32 %v3204_v1, %v394_v54  ;;  %v191_v30 = vld [vmem:[#allocation6 + $0x1d0] sm:$0xff] }
  0x90   :  { %v326_v52 = vadd.f32 %v310_v25, %v224_v46  ;;  %2456 = vmatprep.subr.bf16.mxu1 %v4233_v18  ;;  %1622 = vmatmul.mubr.f32.gmra.mrb[10].mxu0 %v860_v12  ;;  %v861_v4 = vsub.f32 %v3471_v3, %v860_v12  ;;  %v620_v33 = vmul.f32 %v604_v5, %v3385_v8  ;;  %v4258_v38 = vand.u32 4294901760, %v3027_v20  ;;  %v242_v44 = vld [vmem:[#allocation6 + $0x250] sm:$0xff]  ;;  %v447_v20 = vld [vmem:[#allocation6 + $0x458] sm:$0xff] }
  0x91   :  { %v463_v26 = vmul.f32 %v3208_v37, %v445_v36  ;;  %v4259_v24 = vand.u32 4294901760, %v3029_v21  ;;  %1627 = vmatprep.mubr.f32.mxu0 %v4245_v50  ;;  %v542_v46 = vadd.f32 0.7978846, %v526_v31  ;;  %v377_v57 = vadd.f32 %v361_v9, %v275_v17  ;;  %v293_v25 = vld [vmem:[#allocation6 + $0x2d0] sm:$0xff]  ;;  %v396_v21 = vld [vmem:[#allocation6 + $0x3d8] sm:$0xff] }
  0x92   :  { %v428_v54 = vadd.f32 %v412_v32, %v326_v52  ;;  %v72_v42 = vmul.f32 %v3111_v61, %v54_v60  ;;  %v344_v12 = vld [vmem:[#allocation6 + $0x350] sm:$0xff]  ;;  %v862_v3 = vand.u32 4294901760, %v861_v4  ;;  %v3492_v8 = vand.u32 4294901760, %v620_v33 }
  0x93   :  { %v2530_v22 = vpack.c.bf16 %v4259_v24, %v4258_v38  ;;  %v123_v36 = vmul.f32 %v3132_v16, %v105_v6  ;;  %v158_v5 = vmul.f32 %v3148_v35, %v140_v11  ;;  %v558_v38 = vmul.f32 %v542_v46, %v3467_v62  ;;  %v395_v17 = vld [vmem:[#allocation6 + $0x3d0] sm:$0xff]  ;;  %v106_v46 = vld [vmem:[#allocation6 + $0xd8] sm:$0xff] }
  0x94   :  { %4260 = vst [vmem:[#allocation33_spill] sm:$0xff] %v3492_v8  ;;  %v479_v24 = vadd.f32 %v463_v26, %v377_v57  ;;  %v88_v31 = vadd.f32 %v72_v42, %v2856_v0  ;;  %v209_v9 = vmul.f32 %v3151_v40, %v191_v30  ;;  %v446_v60 = vld [vmem:[#allocation6 + $0x450] sm:$0xff]  ;;  %863 = vmatmul.mubr.f32.gmra.mrb[10].mxu1 %v862_v3  ;;  %v55_v30 = vld [vmem:[#allocation6 + $0x58] sm:$0xff]  ;;  %v4262_v42 = vand.u32 4294901760, %v3046_v27 }
  0x95   :  { %2531 = vmatpush1.bf16.msra.mxu0 %v2530_v22  ;;  %v3501_v52 = vsub.f32 %v620_v33, %v3492_v8  ;;  %v260_v32 = vmul.f32 %v3170_v49, %v242_v44  ;;  %v311_v6 = vmul.f32 %v3173_v39, %v293_v25  ;;  %v362_v11 = vmul.f32 %v3184_v14, %v344_v12 }
  0x96   :  { %2532 = vmatprep.subr.bf16.mxu0 %v4233_v18  ;;  %868 = vmatprep.mubr.f32.mxu1 %v4245_v50  ;;  %2755 = vtanh.f32 %v558_v38  ;;  %v3507_v4 = vadd.f32 %v479_v24, %v428_v54  ;;  %v174_v26 = vadd.f32 %v158_v5, %v88_v31  ;;  %v225_v22 = vadd.f32 %v209_v9, %v123_v36  ;;  %v141_v38 = vld [vmem:[#allocation6 + $0x158] sm:$0xff] }
  0x97   :  { %4261 = vst [vmem:[#allocation34_spill] sm:$0xff] %v3501_v52  ;;  %v871_v3 = vand.u32 4294901760, %v3501_v52  ;;  %v413_v33 = vmul.f32 %v3204_v1, %v395_v17  ;;  %v464_v57 = vmul.f32 %v3208_v37, %v446_v60  ;;  %v1086_v44 = vsub.f32 %v3046_v27, %v4262_v42  ;;  %v192_v42 = vld [vmem:[#allocation6 + $0x1d8] sm:$0xff] }
  0x98   :  { %v511_v25 = vmul.f32 %v3507_v4, %v3507_v4  ;;  %v276_v12 = vadd.f32 %v260_v32, %v174_v26  ;;  %v327_v54 = vadd.f32 %v311_v6, %v225_v22  ;;  %v4263_v5 = vand.u32 4294901760, %v3050_v34  ;;  %v2754_v24 = vpop.eup %2753  ;;  %v243_v22 = vld [vmem:[#allocation6 + $0x258] sm:$0xff] }
  0x99   :  { %1631 = vmatmul.mubr.f32.gmra.mrb[12].mxu0 %v871_v3  ;;  %v872_v31 = vsub.f32 %v3501_v52, %v871_v3  ;;  %v1087_v9 = vand.u32 4294901760, %v1086_v44  ;;  %v73_v17 = vmul.f32 %v3111_v61, %v55_v30  ;;  %v124_v60 = vmul.f32 %v3132_v16, %v106_v46 }
  0x9a   :  { %v1096_v36 = vsub.f32 %v3050_v34, %v4263_v5  ;;  %1636 = vmatprep.mubr.f32.mxu0 %v4245_v50  ;;  %v589_v2 = vmul.f32 0.5, %v2754_v24  ;;  %v527_v32 = vmul.f32 0.035677407, %v511_v25  ;;  %v378_v6 = vadd.f32 %v362_v11, %v276_v12 }
  0x9b   :  { %v429_v26 = vadd.f32 %v413_v33, %v327_v54  ;;  %v873_v5 = vand.u32 4294901760, %v872_v31  ;;  %v89_v8 = vadd.f32 %v73_v17, %v2856_v0  ;;  %v159_v3 = vmul.f32 %v3148_v35, %v141_v38  ;;  %v56_v38 = vld [vmem:[#allocation6 + $0x60] sm:$0xff] }
  0x9c   :  { %v1097_v53 = vand.u32 4294901760, %v1096_v36  ;;  %v605_v44 = vadd.f32 0.5, %v589_v2  ;;  %v543_v52 = vadd.f32 0.7978846, %v527_v32  ;;  %v480_v30 = vadd.f32 %v464_v57, %v378_v6 }
  0x9d   :  { %v210_v46 = vmul.f32 %v3151_v40, %v192_v42  ;;  %874 = vmatmul.mubr.f32.gmra.mrb[12].mxu1 %v873_v5  ;;  %v175_v11 = vadd.f32 %v159_v3, %v89_v8  ;;  %v261_v33 = vmul.f32 %v3170_v49, %v243_v22  ;;  %v312_v12 = vmul.f32 %v3173_v39, %v294_v19  ;;  %v142_v42 = vld [vmem:[#allocation6 + $0x160] sm:$0xff] }
  0x9e   :  { %v2457_v25 = vpack.c.bf16 %v1097_v53, %v1087_v9  ;;  %v621_v54 = vmul.f32 %v605_v44, %v3439_v47  ;;  %879 = vmatprep.mubr.f32.mxu1 %v4245_v50  ;;  %v559_v2 = vmul.f32 %v543_v52, %v3507_v4  ;;  %v3532_v36 = vadd.f32 %v480_v30, %v429_v26  ;;  %v107_v9 = vld [vmem:[#allocation6 + $0xe0] sm:$0xff] }
  0x9f   :  { %v226_v57 = vadd.f32 %v210_v46, %v124_v60  ;;  %v277_v24 = vadd.f32 %v261_v33, %v175_v11  ;;  %v363_v31 = vmul.f32 %v3184_v14, %v345_v43  ;;  %v414_v53 = vmul.f32 %v3204_v1, %v396_v21  ;;  %v193_v26 = vld [vmem:[#allocation6 + $0x1e0] sm:$0xff] }
  0xa0   :  { %2458 = vmatpush1.bf16.msra.mxu1 %v2457_v25  ;;  %v465_v8 = vmul.f32 %v3208_v37, %v447_v20  ;;  %v2756_v19 = vpop.eup %2755  ;;  %v3537_v17 = vand.u32 4294901760, %v621_v54  ;;  %2757 = vtanh.f32 %v559_v2  ;;  %v512_v47 = vmul.f32 %v3532_v36, %v3532_v36  ;;  %v244_v22 = vld [vmem:[#allocation6 + $0x260] sm:$0xff] }
  0xa1   :  { %v328_v52 = vadd.f32 %v312_v12, %v226_v57  ;;  %2459 = vmatprep.subr.bf16.mxu1 %v4233_v18  ;;  %v590_v60 = vmul.f32 0.5, %v2756_v19  ;;  %v379_v32 = vadd.f32 %v363_v31, %v277_v24  ;;  %v4264_v43 = vand.u32 4294901760, %v3046_v27  ;;  %v295_v46 = vld [vmem:[#allocation6 + $0x2e0] sm:$0xff] }
  0xa2   :  { %v4265_v21 = vand.u32 4294901760, %v3050_v34  ;;  %v74_v20 = vmul.f32 %v3111_v61, %v56_v38  ;;  %v3548_v5 = vsub.f32 %v621_v54, %v3537_v17  ;;  %v528_v3 = vmul.f32 0.035677407, %v512_v47  ;;  %v346_v2 = vld [vmem:[#allocation6 + $0x360] sm:$0xff] }
  0xa3   :  { %v430_v44 = vadd.f32 %v414_v53, %v328_v52  ;;  %v125_v30 = vmul.f32 %v3132_v16, %v107_v9  ;;  %v606_v25 = vadd.f32 0.5, %v590_v60  ;;  %v481_v11 = vadd.f32 %v465_v8, %v379_v32  ;;  %v397_v31 = vld [vmem:[#allocation6 + $0x3e0] sm:$0xff] }
  0xa4   :  { %v2533_v6 = vpack.c.bf16 %v4265_v21, %v4264_v43  ;;  %v90_v33 = vadd.f32 %v74_v20, %v2856_v0  ;;  %v160_v12 = vmul.f32 %v3148_v35, %v142_v42  ;;  %v882_v57 = vand.u32 4294901760, %v3548_v5  ;;  %v448_v47 = vld [vmem:[#allocation6 + $0x460] sm:$0xff]  ;;  %v57_v20 = vld [vmem:[#allocation6 + $0x68] sm:$0xff] }
  0xa5   :  { %v544_v38 = vadd.f32 0.7978846, %v528_v3  ;;  %v211_v24 = vmul.f32 %v3151_v40, %v193_v26  ;;  %v262_v54 = vmul.f32 %v3170_v49, %v244_v22  ;;  %v622_v53 = vmul.f32 %v606_v25, %v3467_v62  ;;  %v108_v26 = vld [vmem:[#allocation6 + $0xe8] sm:$0xff] }
  0xa6   :  { %2534 = vmatpush1.bf16.msra.mxu0 %v2533_v6  ;;  %v3558_v9 = vadd.f32 %v481_v11, %v430_v44  ;;  %v176_v8 = vadd.f32 %v160_v12, %v90_v33  ;;  %v313_v19 = vmul.f32 %v3173_v39, %v295_v46  ;;  %v883_v52 = vsub.f32 %v3548_v5, %v882_v57  ;;  %v143_v12 = vld [vmem:[#allocation6 + $0x168] sm:$0xff] }
  0xa7   :  { %2535 = vmatprep.subr.bf16.mxu0 %v4233_v18  ;;  %1640 = vmatmul.mubr.f32.gmra.mrb[14].mxu0 %v882_v57  ;;  %v560_v42 = vmul.f32 %v544_v38, %v3532_v36  ;;  %v227_v60 = vadd.f32 %v211_v24, %v125_v30  ;;  %v364_v32 = vmul.f32 %v3184_v14, %v346_v2  ;;  %v3565_v43 = vand.u32 4294901760, %v622_v53 }
  0xa8   :  { %1645 = vmatprep.mubr.f32.mxu0 %v4245_v50  ;;  %v513_v62 = vmul.f32 %v3558_v9, %v3558_v9  ;;  %v278_v21 = vadd.f32 %v262_v54, %v176_v8  ;;  %v415_v6 = vmul.f32 %v3204_v1, %v397_v31  ;;  %v884_v22 = vand.u32 4294901760, %v883_v52  ;;  %v194_v52 = vld [vmem:[#allocation6 + $0x1e8] sm:$0xff] }
  0xa9   :  { %2759 = vtanh.f32 %v560_v42  ;;  %v329_v3 = vadd.f32 %v313_v19, %v227_v60  ;;  %v466_v44 = vmul.f32 %v3208_v37, %v448_v47  ;;  %v3572_v30 = vsub.f32 %v622_v53, %v3565_v43  ;;  %v245_v42 = vld [vmem:[#allocation6 + $0x268] sm:$0xff] }
  0xaa   :  { %v529_v46 = vmul.f32 0.035677407, %v513_v62  ;;  %v380_v25 = vadd.f32 %v364_v32, %v278_v21  ;;  %v4266_v11 = vand.u32 4294901760, %v3086_v41  ;;  %v2758_v2 = vpop.eup %2757  ;;  %885 = vmatmul.mubr.f32.gmra.mrb[14].mxu1 %v884_v22  ;;  %v4267_v38 = vand.u32 4294901760, %v3102_v55 }
  0xab   :  { %v431_v57 = vadd.f32 %v415_v6, %v329_v3  ;;  %v75_v54 = vmul.f32 %v3111_v61, %v57_v20  ;;  %v126_v31 = vmul.f32 %v3132_v16, %v108_v26  ;;  %v893_v53 = vand.u32 4294901760, %v3572_v30  ;;  %890 = vmatprep.mubr.f32.mxu1 %v4245_v50  ;;  %v296_v3 = vld [vmem:[#allocation6 + $0x2e8] sm:$0xff] }
  0xac   :  { %v1106_v33 = vsub.f32 %v3086_v41, %v4266_v11  ;;  %v1116_v24 = vsub.f32 %v3102_v55, %v4267_v38  ;;  %v591_v8 = vmul.f32 0.5, %v2758_v2  ;;  %v545_v19 = vadd.f32 0.7978846, %v529_v46  ;;  %v347_v11 = vld [vmem:[#allocation6 + $0x368] sm:$0xff] }
  0xad   :  { %v482_v47 = vadd.f32 %v466_v44, %v380_v25  ;;  %v91_v62 = vadd.f32 %v75_v54, %v2856_v0  ;;  %v161_v21 = vmul.f32 %v3148_v35, %v143_v12  ;;  %1649 = vmatmul.mubr.f32.gmra.mrb[16].mxu0 %v893_v53  ;;  %v894_v6 = vsub.f32 %v3572_v30, %v893_v53  ;;  %v398_v2 = vld [vmem:[#allocation6 + $0x3e8] sm:$0xff]  ;;  %v58_v54 = vld [vmem:[#allocation6 + $0x70] sm:$0xff] }
  0xae   :  { %v1107_v60 = vand.u32 4294901760, %v1106_v33  ;;  %v1117_v32 = vand.u32 4294901760, %v1116_v24  ;;  %v607_v20 = vadd.f32 0.5, %v591_v8  ;;  %v561_v26 = vmul.f32 %v545_v19, %v3558_v9  ;;  %1654 = vmatprep.mubr.f32.mxu0 %v4245_v50  ;;  %v449_v12 = vld [vmem:[#allocation6 + $0x468] sm:$0xff] }
  0xaf   :  { %v3588_v22 = vadd.f32 %v482_v47, %v431_v57  ;;  %v177_v46 = vadd.f32 %v161_v21, %v91_v62  ;;  %v212_v25 = vmul.f32 %v3151_v40, %v194_v52  ;;  %v263_v33 = vmul.f32 %v3170_v49, %v245_v42  ;;  %v109_v52 = vld [vmem:[#allocation6 + $0xf0] sm:$0xff] }
  0xb0   :  { %v2460_v44 = vpack.c.bf16 %v1117_v32, %v1107_v60  ;;  %v895_v38 = vand.u32 4294901760, %v894_v6  ;;  %v623_v24 = vmul.f32 %v607_v20, %v3507_v4  ;;  %2761 = vtanh.f32 %v561_v26  ;;  %v144_v62 = vld [vmem:[#allocation6 + $0x170] sm:$0xff] }
  0xb1   :  { %v514_v57 = vmul.f32 %v3588_v22, %v3588_v22  ;;  %v228_v53 = vadd.f32 %v212_v25, %v126_v31  ;;  %v279_v8 = vadd.f32 %v263_v33, %v177_v46  ;;  %v314_v19 = vmul.f32 %v3173_v39, %v296_v3 }
  0xb2   :  { %2461 = vmatpush1.bf16.msra.mxu1 %v2460_v44  ;;  %v365_v47 = vmul.f32 %v3184_v14, %v347_v11  ;;  %v3598_v42 = vand.u32 4294901760, %v623_v24  ;;  %v416_v32 = vmul.f32 %v3204_v1, %v398_v2  ;;  %v467_v4 = vmul.f32 %v3208_v37, %v449_v12  ;;  %v195_v44 = vld [vmem:[#allocation6 + $0x1f0] sm:$0xff] }
  0xb3   :  { %896 = vmatmul.mubr.f32.gmra.mrb[16].mxu1 %v895_v38  ;;  %v530_v60 = vmul.f32 0.035677407, %v514_v57  ;;  %v2760_v21 = vpop.eup %2759  ;;  %v330_v6 = vadd.f32 %v314_v19, %v228_v53  ;;  %v4268_v20 = vand.u32 4294901760, %v3086_v41  ;;  %v4269_v26 = vand.u32 4294901760, %v3102_v55  ;;  %v246_v12 = vld [vmem:[#allocation6 + $0x270] sm:$0xff] }
  0xb4   :  { %901 = vmatprep.mubr.f32.mxu1 %v4245_v50  ;;  %v381_v31 = vadd.f32 %v365_v47, %v279_v8  ;;  %v76_v11 = vmul.f32 %v3111_v61, %v58_v54  ;;  %v3609_v46 = vsub.f32 %v623_v24, %v3598_v42  ;;  %v592_v25 = vmul.f32 0.5, %v2760_v21  ;;  %v297_v38 = vld [vmem:[#allocation6 + $0x2f0] sm:$0xff] }
  0xb5   :  { %v2536_v3 = vpack.c.bf16 %v4269_v26, %v4268_v20  ;;  %v546_v33 = vadd.f32 0.7978846, %v530_v60  ;;  %v127_v2 = vmul.f32 %v3132_v16, %v109_v52  ;;  %v432_v57 = vadd.f32 %v416_v32, %v330_v6  ;;  %v348_v21 = vld [vmem:[#allocation6 + $0x370] sm:$0xff] }
  0xb6   :  { %v483_v53 = vadd.f32 %v467_v4, %v381_v31  ;;  %v92_v8 = vadd.f32 %v76_v11, %v2856_v0  ;;  %v162_v19 = vmul.f32 %v3148_v35, %v144_v62  ;;  %v904_v47 = vand.u32 4294901760, %v3609_v46  ;;  %v399_v60 = vld [vmem:[#allocation6 + $0x3f0] sm:$0xff] }
  0xb7   :  { %2537 = vmatpush1.bf16.msra.mxu0 %v2536_v3  ;;  %v608_v54 = vadd.f32 0.5, %v592_v25  ;;  %v562_v20 = vmul.f32 %v546_v33, %v3588_v22  ;;  %v213_v24 = vmul.f32 %v3151_v40, %v195_v44  ;;  %v264_v32 = vmul.f32 %v3170_v49, %v246_v12  ;;  %v450_v6 = vld [vmem:[#allocation6 + $0x470] sm:$0xff] }
  0xb8   :  { %v3617_v26 = vadd.f32 %v483_v53, %v432_v57  ;;  %v178_v52 = vadd.f32 %v162_v19, %v92_v8  ;;  %v315_v4 = vmul.f32 %v3173_v39, %v297_v38  ;;  %1658 = vmatmul.mubr.f32.gmra.mrb[18].mxu0 %v904_v47  ;;  %v905_v62 = vsub.f32 %v3609_v46, %v904_v47 }
  0xb9   :  { %v624_v31 = vmul.f32 %v608_v54, %v3532_v36  ;;  %2763 = vtanh.f32 %v562_v20  ;;  %v229_v3 = vadd.f32 %v213_v24, %v127_v2  ;;  %1663 = vmatprep.mubr.f32.mxu0 %v4245_v50  ;;  %v366_v25 = vmul.f32 %v3184_v14, %v348_v21  ;;  %v59_v20 = vld [vmem:[#allocation6 + $0x78] sm:$0xff] }
  0xba   :  { %v515_v11 = vmul.f32 %v3617_v26, %v3617_v26  ;;  %v280_v44 = vadd.f32 %v264_v32, %v178_v52  ;;  %v417_v33 = vmul.f32 %v3204_v1, %v399_v60  ;;  %v2762_v12 = vpop.eup %2761  ;;  %v906_v38 = vand.u32 4294901760, %v905_v62 }
  0xbb   :  { %v3628_v57 = vand.u32 4294901760, %v624_v31  ;;  %v331_v53 = vadd.f32 %v315_v4, %v229_v3  ;;  %v468_v8 = vmul.f32 %v3208_v37, %v450_v6  ;;  %v593_v36 = vmul.f32 0.5, %v2762_v12 }
  0xbc   :  { %v531_v19 = vmul.f32 0.035677407, %v515_v11  ;;  %v382_v2 = vadd.f32 %v366_v25, %v280_v44  ;;  %v4270_v47 = vand.u32 4294901760, %v3159_v58  ;;  %907 = vmatmul.mubr.f32.gmra.mrb[18].mxu1 %v906_v38  ;;  %v4272_v32 = vand.u32 4294901760, %v3197_v10  ;;  %v110_v44 = vld [vmem:[#allocation6 + $0xf8] sm:$0xff] }
  0xbd   :  { %v3635_v24 = vsub.f32 %v624_v31, %v3628_v57  ;;  %v433_v21 = vadd.f32 %v417_v33, %v331_v53  ;;  %912 = vmatprep.mubr.f32.mxu1 %v4245_v50  ;;  %v609_v6 = vadd.f32 0.5, %v593_v36  ;;  %v4273_v33 = vand.u32 4294901760, %v3166_v59  ;;  %v145_v53 = vld [vmem:[#allocation6 + $0x178] sm:$0xff] }
  0xbe   :  { %v1131_v54 = vsub.f32 %v3159_v58, %v4270_v47  ;;  %v4271_v60 = vmov %v4270_v47  ;;  %v1126_v4 = vsub.f32 %v3197_v10, %v4272_v32  ;;  %v547_v62 = vadd.f32 0.7978846, %v531_v19  ;;  %v196_v19 = vld [vmem:[#allocation6 + $0x1f8] sm:$0xff] }
  0xbf   :  { %v2538_v52 = vpack.c.bf16 %v4271_v60, %v4245_v50  ;;  %v484_v3 = vadd.f32 %v468_v8, %v382_v2  ;;  %v915_v25 = vand.u32 4294901760, %v3635_v24  ;;  %v1136_v12 = vsub.f32 %v3166_v59, %v4273_v33  ;;  %v247_v2 = vld [vmem:[#allocation6 + $0x278] sm:$0xff] }
  0xc0   :  { %v1132_v11 = vand.u32 4294901760, %v1131_v54  ;;  %v1127_v31 = vand.u32 4294901760, %v1126_v4  ;;  %v77_v38 = vmul.f32 %v3111_v61, %v59_v20  ;;  %v625_v47 = vmul.f32 %v609_v6, %v3558_v9  ;;  %v349_v6 = vld [vmem:[#allocation6 + $0x378] sm:$0xff] }
  0xc1   :  { %2539 = vmatprep.subr.bf16.mxu0 %v2538_v52  ;;  %v563_v60 = vmul.f32 %v547_v62, %v3617_v26  ;;  %v3651_v36 = vadd.f32 %v484_v3, %v433_v21  ;;  %1667 = vmatmul.mubr.f32.gmra.mrb[20].mxu0 %v915_v25  ;;  %v916_v54 = vsub.f32 %v3635_v24, %v915_v25  ;;  %v1137_v52 = vand.u32 4294901760, %v1136_v12  ;;  %v298_v21 = vld [vmem:[#allocation6 + $0x2f8] sm:$0xff] }
  0xc2   :  { %v2462_v8 = vpack.c.bf16 %v1132_v11, %v4245_v50  ;;  %v93_v32 = vadd.f32 %v77_v38, %v2856_v0  ;;  %v128_v4 = vmul.f32 %v3132_v16, %v110_v44  ;;  %1672 = vmatprep.mubr.f32.mxu0 %v4245_v50  ;;  %v3658_v61 = vand.u32 4294901760, %v625_v47  ;;  %v400_v62 = vld [vmem:[#allocation6 + $0x3f8] sm:$0xff] }
  0xc3   :  { %2765 = vtanh.f32 %v563_v60  ;;  %v516_v9 = vmul.f32 %v3651_v36, %v3651_v36  ;;  %v163_v20 = vmul.f32 %v3148_v35, %v145_v53  ;;  %v2764_v3 = vpop.eup %2763  ;;  %v917_v11 = vand.u32 4294901760, %v916_v54  ;;  %v451_v60 = vld [vmem:[#allocation6 + $0x478] sm:$0xff] }
  0xc4   :  { %2463 = vmatprep.subr.bf16.mxu1 %v2462_v8  ;;  %v2464_v25 = vpack.c.bf16 %v1137_v52, %v1127_v31  ;;  %v214_v0 = vmul.f32 %v3151_v40, %v196_v19  ;;  %v265_v16 = vmul.f32 %v3170_v49, %v247_v2  ;;  %v3666_v44 = vsub.f32 %v625_v47, %v3658_v61 }
  0xc5   :  { %v594_v33 = vmul.f32 0.5, %v2764_v3  ;;  %v532_v12 = vmul.f32 0.035677407, %v516_v9  ;;  %v179_v38 = vadd.f32 %v163_v20, %v93_v32  ;;  %918 = vmatmul.mubr.f32.gmra.mrb[20].mxu1 %v917_v11  ;;  %v316_v35 = vmul.f32 %v3173_v39, %v298_v21 }
  0xc6   :  { %v230_v8 = vadd.f32 %v214_v0, %v128_v4  ;;  %v367_v53 = vmul.f32 %v3184_v14, %v349_v6  ;;  %v418_v54 = vmul.f32 %v3204_v1, %v400_v62  ;;  %v926_v31 = vand.u32 4294901760, %v3666_v44  ;;  %923 = vmatprep.mubr.f32.mxu1 %v4245_v50  ;;  %2465 = vmatpush1.bf16.msra.mxu1 %v2464_v25 }
  0xc7   :  { %v610_v49 = vadd.f32 0.5, %v594_v33  ;;  %v548_v40 = vadd.f32 0.7978846, %v532_v12  ;;  %v281_v47 = vadd.f32 %v265_v16, %v179_v38  ;;  %v469_v2 = vmul.f32 %v3208_v37, %v451_v60  ;;  %2466 = vmatprep.subr.bf16.mxu1 %v4233_v18 }
  0xc8   :  { %v332_v19 = vadd.f32 %v316_v35, %v230_v8  ;;  %v4274_v52 = vand.u32 4294901760, %v3197_v10  ;;  %v4275_v32 = vand.u32 4294901760, %v3166_v59  ;;  %1676 = vmatmul.mubr.f32.gmra.mrb[22].mxu0 %v926_v31  ;;  %v927_v1 = vsub.f32 %v3666_v44, %v926_v31 }
  0xc9   :  { %v626_v14 = vmul.f32 %v610_v49, %v3588_v22  ;;  %v564_v4 = vmul.f32 %v548_v40, %v3651_v36  ;;  %v383_v9 = vadd.f32 %v367_v53, %v281_v47  ;;  %1681 = vmatprep.mubr.f32.mxu0 %v4245_v50  ;;  %vm2347_vm1 = vcmask 8192  }
  0xca   :  { %v2540_v39 = vpack.c.bf16 %v4275_v32, %v4274_v52  ;;  %v434_v20 = vadd.f32 %v418_v54, %v332_v19  ;;  %v928_v37 = vand.u32 4294901760, %v927_v1 }
  0xcb   :  { %v3683_v21 = vand.u32 4294901760, %v626_v14  ;;  %2767 = vtanh.f32 %v564_v4  ;;  %v485_v6 = vadd.f32 %v469_v2, %v383_v9 }
  0xcc   :  { %2541 = vmatpush1.bf16.msra.mxu0 %v2540_v39  ;;  %929 = vmatmul.mubr.f32.gmra.mrb[22].mxu1 %v928_v37 }
  0xcd   :  { %2542 = vmatprep.subr.bf16.mxu0 %v4233_v18  ;;  %v2766_v62 = vpop.eup %2765  ;;  %v3687_v3 = vsub.f32 %v626_v14, %v3683_v21  ;;  %v501_v22 = vadd.f32 %v485_v6, %v434_v20  ;;  %934 = vmatprep.mubr.f32.mxu1 %v4245_v50 }
  0xce   :  { %v595_v11 = vmul.f32 0.5, %v2766_v62 }
  0xcf   :  { %v937_v25 = vand.u32 4294901760, %v3687_v3  ;;  %v517_v0 = vmul.f32 %v501_v22, %v501_v22 }
  0xd0   :  { %v611_v16 = vadd.f32 0.5, %v595_v11 }
  0xd1   :  { %1685 = vmatmul.mubr.f32.gmra.mrb[24].mxu0 %v937_v25  ;;  %v938_v33 = vsub.f32 %v3687_v3, %v937_v25  ;;  %v533_v12 = vmul.f32 0.035677407, %v517_v0  ;;  %v4276_v0 = vmov 1.0|1.0  }
  0xd2   :  { %1690 = vmatprep.mubr.f32.mxu0 %v4245_v50  ;;  %v627_v38 = vmul.f32 %v611_v16, %v3617_v26 }
  0xd3   :  { %v939_v60 = vand.u32 4294901760, %v938_v33  ;;  %v549_v8 = vadd.f32 0.7978846, %v533_v12  ;;  %v4278_v33 = vld [vmem:[#allocation11_spill] sm:$0xff]  ;;  %v4279_v12 = vld [vmem:[#allocation13_spill] sm:$0xff] }
  0xd4   :  { %v3694_v35 = vand.u32 4294901760, %v627_v38 }
  0xd5   :  { %v2768_v53 = vpop.eup %2767  ;;  %940 = vmatmul.mubr.f32.gmra.mrb[24].mxu1 %v939_v60  ;;  %v565_v54 = vmul.f32 %v549_v8, %v501_v22  ;;  %v4283_v8 = vld [vmem:[#allocation18_spill] sm:$0xff] }
  0xd6   :  { %v3697_v31 = vsub.f32 %v627_v38, %v3694_v35  ;;  %945 = vmatprep.mubr.f32.mxu1 %v4245_v50  ;;  %v596_v49 = vmul.f32 0.5, %v2768_v53  ;;  %v2473_v38 = vpack.c.bf16 %v2954_v48, %v2939_v45  ;;  %v2476_v45 = vpack.c.bf16 %v3004_v13, %v2969_v56  ;;  %v4284_v53 = vld [vmem:[#allocation19_spill] sm:$0xff] }
  0xd7   :  { %2769 = vtanh.f32 %v565_v54  ;;  %v2479_v56 = vpack.c.bf16 %v4284_v53, %v4283_v8  ;;  %v4286_v54 = vld [vmem:[#allocation31_spill] sm:$0xff] }
  0xd8   :  { %v948_v40 = vand.u32 4294901760, %v3697_v31  ;;  %v612_v47 = vadd.f32 0.5, %v596_v49  ;;  %v2482_v49 = vpack.c.bf16 %v3050_v34, %v3046_v27  ;;  %v2485_v27 = vpack.c.bf16 %v3102_v55, %v3086_v41 }
  0xd9   :  { %v2489_v55 = vpack.c.bf16 %v3166_v59, %v3197_v10  ;;  %v4293_v59 = vld [vmem:[#allocation26_spill] sm:$0xff]  ;;  %v4295_v10 = vld [vmem:[#allocation28_spill] sm:$0xff] }
  0xda   :  { %1694 = vmatmul.mubr.f32.gmra.mrb[26].mxu0 %v948_v40  ;;  %v949_v26 = vsub.f32 %v3697_v31, %v948_v40  ;;  %v628_v19 = vmul.f32 %v612_v47, %v3651_v36  ;;  %v4288_v47 = vld [vmem:[#allocation33_spill] sm:$0xff] }
  0xdb   :  { %1699 = vmatprep.mubr.f32.mxu0 %v4245_v50 }
  0xdc   :  { %v950_v2 = vand.u32 4294901760, %v949_v26  ;;  %v3704_v52 = vand.u32 4294901760, %v628_v19  ;;  %v2487_v26 = vpack.c.bf16 %v3159_v58, %v4245_v50  ;;  %v4294_v58 = vld [vmem:[#allocation27_spill] sm:$0xff] }
  0xde   :  { %951 = vmatmul.mubr.f32.gmra.mrb[26].mxu1 %v950_v2  ;;  %v3707_v32 = vsub.f32 %v628_v19, %v3704_v52  ;;  %v4290_v19 = vld [vmem:[#allocation14_spill] sm:$0xff] }
  0xdf   :  { %956 = vmatprep.mubr.f32.mxu1 %v4245_v50 }
  0xe0   :  { %v959_v39 = vand.u32 4294901760, %v3707_v32 }
  0xe1   :  { %v2770_v1 = vpop.eup %2769 }
  0xe2   :  { %1703 = vmatmul.mubr.f32.gmra.mrb[28].mxu0 %v959_v39  ;;  %v960_v14 = vsub.f32 %v3707_v32, %v959_v39  ;;  %v597_v4 = vmul.f32 0.5, %v2770_v1 }
  0xe3   :  { %1708 = vmatprep.mubr.f32.mxu0 %v4245_v50 }
  0xe4   :  { %v961_v36 = vand.u32 4294901760, %v960_v14  ;;  %v613_v9 = vadd.f32 0.5, %v597_v4 }
  0xe6   :  { %962 = vmatmul.mubr.f32.gmra.mrb[28].mxu1 %v961_v36  ;;  %v629_v20 = vmul.f32 %v613_v9, %v501_v22  ;;  %v2467_v22 = vpack.c.bf16 %v2893_v29, %v2881_v23  ;;  %v2470_v23 = vpack.c.bf16 %v4279_v12, %v4278_v33 }
  0xe7   :  { %967 = vmatprep.mubr.f32.mxu1 %v4245_v50 }
  0xe8   :  { %v3714_v37 = vand.u32 4294901760, %v629_v20 }
  0xea   :  { %v3717_v6 = vsub.f32 %v629_v20, %v3714_v37 }
  0xec   :  { %v970_v62 = vand.u32 4294901760, %v3717_v6 }
  0xee   :  { %1712 = vmatmul.mubr.f32.gmra.mrb[30].mxu0 %v970_v62  ;;  %v971_v11 = vsub.f32 %v3717_v6, %v970_v62 }
  0xef   :  { %1846 = vmatprep.mubr.f32.mxu0 %v4245_v50 }
  0xf0   :  { %v972_v25 = vand.u32 4294901760, %v971_v11 }
  0xf2   :  { %973 = vmatmul.mubr.f32.gmra.mrb[30].mxu1 %v972_v25  ;;  %1848 = vmatmul.mubr.f32.vlgmr.msra.gmra.mrb[0].mxu0 %v3328_v63 }
  0xf3   :  { %1171 = vmatprep.mubr.f32.mxu1 %v4245_v50  ;;  %1853 = vmatprep.mubr.f32.mxu0 %v4245_v50 }
  0xf4   :  { %2544 = vmatpush1.bf16.msk.msra.mxu0 %vm2886_vm4, %v4276_v0 }
  0xf5   :  { %2545 = vmatprep.subr.bf16.mxu0 %v4233_v18 }
  0xf6   :  { %1173 = vmatmul.mubr.f32.vlgmr.msra.gmra.mrb[0].mxu1 %v3328_v63  ;;  %1855 = vmatmul.mubr.f32.gmra.mrb[2].mxu0 %v3356_v51 }
  0xf7   :  { %2468 = vmatpush1.bf16.msra.mxu1 %v2467_v22  ;;  %1178 = vmatprep.mubr.f32.mxu1 %v4245_v50 }
  0xf8   :  { %1860 = vmatprep.mubr.f32.mxu0 %v4245_v50  ;;  %2469 = vmatprep.subr.bf16.mxu1 %v4233_v18 }
  0xf9   :  { %2547 = vmatpush1.bf16.msk.msra.mxu0 %vm2904_vm5, %v4276_v0 }
  0xfa   :  { %1180 = vmatmul.mubr.f32.gmra.mrb[2].mxu1 %v3356_v51  ;;  %1862 = vmatmul.mubr.f32.gmra.mrb[4].mxu0 %v3378_v15 }
  0xfb   :  { %1185 = vmatprep.mubr.f32.mxu1 %v4245_v50  ;;  %1867 = vmatprep.mubr.f32.mxu0 %v4245_v50 }
  0xfc   :  { %2471 = vmatpush1.bf16.msra.mxu1 %v2470_v23  ;;  %2548 = vmatprep.subr.bf16.mxu0 %v4233_v18 }
  0xfd   :  { %2472 = vmatprep.subr.bf16.mxu1 %v4233_v18  ;;  %2550 = vmatpush1.bf16.msk.msra.mxu0 %vm2950_vm10, %v4276_v0  ;;  %vm2313_vm10 = vcmask 15361  }
  0xfe   :  { %1187 = vmatmul.mubr.f32.gmra.mrb[4].mxu1 %v3378_v15  ;;  %1869 = vmatmul.mubr.f32.gmra.mrb[6].mxu0 %v3409_v7 }
  0xff   :  { %1192 = vmatprep.mubr.f32.mxu1 %v4245_v50  ;;  %1874 = vmatprep.mubr.f32.mxu0 %v4245_v50 }
 0x100   :  { %2474 = vmatpush1.bf16.msra.mxu1 %v2473_v38  ;;  %2551 = vmatprep.subr.bf16.mxu0 %v4233_v18 }
 0x101   :  { %2475 = vmatprep.subr.bf16.mxu1 %v4233_v18  ;;  %2553 = vmatpush1.bf16.msk.msra.mxu0 %vm2988_vm12, %v4276_v0  ;;  %vm2215_vm12 = vcmask 1040384  }
 0x102   :  { %1194 = vmatmul.mubr.f32.gmra.mrb[6].mxu1 %v3409_v7  ;;  %1876 = vmatmul.mubr.f32.gmra.mrb[8].mxu0 %v3435_v28 }
 0x103   :  { %1199 = vmatprep.mubr.f32.mxu1 %v4245_v50  ;;  %1881 = vmatprep.mubr.f32.mxu0 %v4245_v50 }
 0x104   :  { %2477 = vmatpush1.bf16.msra.mxu1 %v2476_v45  ;;  %2554 = vmatprep.subr.bf16.mxu0 %v4233_v18 }
 0x105   :  { %2478 = vmatprep.subr.bf16.mxu1 %v4233_v18  ;;  %2556 = vmatpush1.bf16.msk.msra.mxu0 %vm3023_vm0, %v4276_v0  ;;  %vm2316_vm0 = vcmask 15360  }
 0x106   :  { %1201 = vmatmul.mubr.f32.gmra.mrb[8].mxu1 %v3435_v28  ;;  %1883 = vmatmul.mubr.f32.gmra.mrb[10].mxu0 %v4286_v54 }
 0x107   :  { %1206 = vmatprep.mubr.f32.mxu1 %v4245_v50  ;;  %1888 = vmatprep.mubr.f32.mxu0 %v4245_v50 }
 0x108   :  { %2480 = vmatpush1.bf16.msra.mxu1 %v2479_v56  ;;  %2557 = vmatprep.subr.bf16.mxu0 %v4233_v18 }
 0x109   :  { %2481 = vmatprep.subr.bf16.mxu1 %v4233_v18  ;;  %2559 = vmatpush1.bf16.msk.msra.mxu0 %vm3097_vm6, %v4276_v0 }
 0x10a   :  { %1208 = vmatmul.mubr.f32.gmra.mrb[10].mxu1 %v4286_v54  ;;  %1890 = vmatmul.mubr.f32.gmra.mrb[12].mxu0 %v4288_v47 }
 0x10b   :  { %1213 = vmatprep.mubr.f32.mxu1 %v4245_v50  ;;  %1895 = vmatprep.mubr.f32.mxu0 %v4245_v50 }
 0x10c   :  { %2483 = vmatpush1.bf16.msra.mxu1 %v2482_v49  ;;  %2560 = vmatprep.subr.bf16.mxu0 %v4233_v18 }
 0x10d   :  { %2484 = vmatprep.subr.bf16.mxu1 %v4233_v18  ;;  %2562 = vmatpush1.bf16.msk.msra.mxu0 %vm3140_vm9, %v4276_v0 }
 0x10e   :  { %1215 = vmatmul.mubr.f32.gmra.mrb[12].mxu1 %v4288_v47  ;;  %1897 = vmatmul.mubr.f32.gmra.mrb[14].mxu0 %v3537_v17 }
 0x10f   :  { %1220 = vmatprep.mubr.f32.mxu1 %v4245_v50  ;;  %1902 = vmatprep.mubr.f32.mxu0 %v4245_v50 }
 0x110   :  { %2486 = vmatpush1.bf16.msra.mxu1 %v2485_v27  ;;  %2565 = vmatprep.subr.msk.bf16.mxu0 %vm3155_vm14, %v4290_v19 }
 0x111   :  { %2488 = vmatprep.subr.bf16.mxu1 %v2487_v26  ;;  %2567 = vmatpush1.bf16.msk.msra.mxu0 %vm3193_vm15, %v4276_v0 }
 0x112   :  { %1222 = vmatmul.mubr.f32.gmra.mrb[14].mxu1 %v3537_v17  ;;  %1904 = vmatmul.mubr.f32.gmra.mrb[16].mxu0 %v3565_v43 }
 0x113   :  { %1227 = vmatprep.mubr.f32.mxu1 %v4245_v50  ;;  %1909 = vmatprep.mubr.f32.mxu0 %v4245_v50 }
 0x114   :  { %2490 = vmatpush1.bf16.msra.mxu1 %v2489_v55 }
 0x116   :  { %1229 = vmatmul.mubr.f32.gmra.mrb[16].mxu1 %v3565_v43  ;;  %1911 = vmatmul.mubr.f32.gmra.mrb[18].mxu0 %v3598_v42 }
 0x117   :  { %1234 = vmatprep.mubr.f32.mxu1 %v4245_v50  ;;  %1916 = vmatprep.mubr.f32.mxu0 %v4245_v50 }
 0x11a   :  { %1236 = vmatmul.mubr.f32.gmra.mrb[18].mxu1 %v3598_v42  ;;  %1918 = vmatmul.mubr.f32.gmra.mrb[20].mxu0 %v3628_v57 }
 0x11b   :  { %1241 = vmatprep.mubr.f32.mxu1 %v4245_v50  ;;  %1923 = vmatprep.mubr.f32.mxu0 %v4245_v50 }
 0x11e   :  { %1243 = vmatmul.mubr.f32.gmra.mrb[20].mxu1 %v3628_v57  ;;  %1925 = vmatmul.mubr.f32.gmra.mrb[22].mxu0 %v3658_v61 }
 0x11f   :  { %1248 = vmatprep.mubr.f32.mxu1 %v4245_v50  ;;  %1930 = vmatprep.mubr.f32.mxu0 %v4245_v50 }
 0x122   :  { %1250 = vmatmul.mubr.f32.gmra.mrb[22].mxu1 %v3658_v61  ;;  %1932 = vmatmul.mubr.f32.gmra.mrb[24].mxu0 %v3683_v21 }
 0x123   :  { %1255 = vmatprep.mubr.f32.mxu1 %v4245_v50  ;;  %1937 = vmatprep.mubr.f32.mxu0 %v4245_v50 }
 0x126   :  { %1257 = vmatmul.mubr.f32.gmra.mrb[24].mxu1 %v3683_v21  ;;  %1939 = vmatmul.mubr.f32.gmra.mrb[26].mxu0 %v3694_v35 }
 0x127   :  { %1262 = vmatprep.mubr.f32.mxu1 %v4245_v50  ;;  %1944 = vmatprep.mubr.f32.mxu0 %v4245_v50 }
 0x12a   :  { %1264 = vmatmul.mubr.f32.gmra.mrb[26].mxu1 %v3694_v35  ;;  %1946 = vmatmul.mubr.f32.gmra.mrb[28].mxu0 %v3704_v52 }
 0x12b   :  { %1269 = vmatprep.mubr.f32.mxu1 %v4245_v50  ;;  %1951 = vmatprep.mubr.f32.mxu0 %v4245_v50 }
 0x12e   :  { %1271 = vmatmul.mubr.f32.gmra.mrb[28].mxu1 %v3704_v52  ;;  %1953 = vmatmul.mubr.f32.gmra.mrb[30].mxu0 %v3714_v37 }
 0x12f   :  { %1276 = vmatprep.mubr.f32.mxu1 %v4245_v50  ;;  %2023 = vmatprep.mubr.f32.mxu0 %v4245_v50 }
 0x132   :  { %1278 = vmatmul.mubr.f32.gmra.mrb[30].mxu1 %v3714_v37  ;;  %2025 = vmatmul.mubr.f32.vlgmr.msra.gmra.mrb[0].mxu0 %v3328_v63  ;;  %v4296_v63 = vld [vmem:[#allocation29_spill] sm:$0xff] }
 0x133   :  { %1380 = vmatprep.mubr.f32.mxu1 %v4245_v50  ;;  %2030 = vmatprep.mubr.f32.mxu0 %v4245_v50 }
 0x136   :  { %1383 = vmatmul.mubr.f32.vlgmr.msra.gmra.mrb[0].mxu1 %v4293_v59  ;;  %2032 = vmatmul.mubr.f32.gmra.mrb[2].mxu0 %v3356_v51  ;;  %v4297_v51 = vld [vmem:[#allocation30_spill] sm:$0xff] }
 0x137   :  { %1388 = vmatprep.mubr.f32.mxu1 %v4245_v50  ;;  %2037 = vmatprep.mubr.f32.mxu0 %v4245_v50 }
 0x13a   :  { %1391 = vmatmul.mubr.f32.gmra.mrb[2].mxu1 %v4294_v58  ;;  %2039 = vmatmul.mubr.f32.gmra.mrb[4].mxu0 %v3378_v15  ;;  %v4298_v15 = vld [vmem:[#allocation32_spill] sm:$0xff] }
 0x13b   :  { %1396 = vmatprep.mubr.f32.mxu1 %v4245_v50  ;;  %2044 = vmatprep.mubr.f32.mxu0 %v4245_v50 }
 0x13e   :  { %1399 = vmatmul.mubr.f32.gmra.mrb[4].mxu1 %v4295_v10  ;;  %2046 = vmatmul.mubr.f32.gmra.mrb[6].mxu0 %v3409_v7  ;;  %v4299_v7 = vld [vmem:[#allocation34_spill] sm:$0xff] }
 0x13f   :  { %1404 = vmatprep.mubr.f32.mxu1 %v4245_v50  ;;  %2051 = vmatprep.mubr.f32.mxu0 %v4245_v50 }
 0x142   :  { %1407 = vmatmul.mubr.f32.gmra.mrb[6].mxu1 %v4296_v63  ;;  %2053 = vmatmul.mubr.f32.gmra.mrb[8].mxu0 %v3435_v28 }
 0x143   :  { %1412 = vmatprep.mubr.f32.mxu1 %v4245_v50  ;;  %2058 = vmatprep.mubr.f32.mxu0 %v4245_v50 }
 0x146   :  { %1415 = vmatmul.mubr.f32.gmra.mrb[8].mxu1 %v4297_v51  ;;  %2060 = vmatmul.mubr.f32.gmra.mrb[10].mxu0 %v4286_v54 }
 0x147   :  { %1420 = vmatprep.mubr.f32.mxu1 %v4245_v50  ;;  %2065 = vmatprep.mubr.f32.mxu0 %v4245_v50 }
 0x14a   :  { %1423 = vmatmul.mubr.f32.gmra.mrb[10].mxu1 %v4298_v15  ;;  %2067 = vmatmul.mubr.f32.gmra.mrb[12].mxu0 %v4288_v47 }
 0x14b   :  { %1428 = vmatprep.mubr.f32.mxu1 %v4245_v50  ;;  %2072 = vmatprep.mubr.f32.mxu0 %v4245_v50 }
 0x14e   :  { %1431 = vmatmul.mubr.f32.gmra.mrb[12].mxu1 %v4299_v7  ;;  %2074 = vmatmul.mubr.f32.gmra.mrb[14].mxu0 %v3537_v17 }
 0x14f   :  { %1436 = vmatprep.mubr.f32.mxu1 %v4245_v50  ;;  %2079 = vmatprep.mubr.f32.mxu0 %v4245_v50 }
 0x152   :  { %1439 = vmatmul.mubr.f32.gmra.mrb[14].mxu1 %v3548_v5  ;;  %2081 = vmatmul.mubr.f32.gmra.mrb[16].mxu0 %v3565_v43  ;;  %v4300_v43 = vld [vmem:[#allocation9_spill] sm:$0xff] }
 0x153   :  { %1444 = vmatprep.mubr.f32.mxu1 %v4245_v50  ;;  %2086 = vmatprep.mubr.f32.mxu0 %v4245_v50  ;;  %vm2136_vm4 = vcmp.eq.s32.totalorder %v4300_v43, 0 }
 0x156   :  { %1447 = vmatmul.mubr.f32.gmra.mrb[16].mxu1 %v3572_v30  ;;  %2088 = vmatmul.mubr.f32.gmra.mrb[18].mxu0 %v3598_v42  ;;  %v4301_v42 = vld [vmem:[#allocation21_spill] sm:$0xff] }
 0x157   :  { %1452 = vmatprep.mubr.f32.mxu1 %v4245_v50  ;;  %2093 = vmatprep.mubr.f32.mxu0 %v4245_v50  ;;  %vm2139_vm5 = vcmp.eq.s32.totalorder %v4301_v42, 129 }
 0x15a   :  { %1455 = vmatmul.mubr.f32.gmra.mrb[18].mxu1 %v3609_v46  ;;  %2095 = vmatmul.mubr.f32.gmra.mrb[20].mxu0 %v3628_v57 }
 0x15b   :  { %1460 = vmatprep.mubr.f32.mxu1 %v4245_v50  ;;  %2100 = vmatprep.mubr.f32.mxu0 %v4245_v50 }
 0x15e   :  { %1463 = vmatmul.mubr.f32.gmra.mrb[20].mxu1 %v3635_v24  ;;  %2102 = vmatmul.mubr.f32.gmra.mrb[22].mxu0 %v3658_v61 }
 0x15f   :  { %1468 = vmatprep.mubr.f32.mxu1 %v4245_v50  ;;  %2107 = vmatprep.mubr.f32.mxu0 %v4245_v50 }
 0x162   :  { %1471 = vmatmul.mubr.f32.gmra.mrb[22].mxu1 %v3666_v44  ;;  %2109 = vmatmul.mubr.f32.gmra.mrb[24].mxu0 %v3683_v21  ;;  %v4302_v44 = vld [vmem:[#allocation20_spill] sm:$0xff] }
 0x163   :  { %1476 = vmatprep.mubr.f32.mxu1 %v4245_v50  ;;  %2114 = vmatprep.mubr.f32.mxu0 %v4245_v50 }
 0x166   :  { %1479 = vmatmul.mubr.f32.gmra.mrb[24].mxu1 %v3687_v3  ;;  %2116 = vmatmul.mubr.f32.gmra.mrb[26].mxu0 %v3694_v35 }
 0x167   :  { %1484 = vmatprep.mubr.f32.mxu1 %v4245_v50  ;;  %2121 = vmatprep.mubr.f32.mxu0 %v4245_v50 }
 0x16a   :  { %1487 = vmatmul.mubr.f32.gmra.mrb[26].mxu1 %v3697_v31  ;;  %2123 = vmatmul.mubr.f32.gmra.mrb[28].mxu0 %v3704_v52 }
 0x16b   :  { %1492 = vmatprep.mubr.f32.mxu1 %v4245_v50  ;;  %2128 = vmatprep.mubr.f32.mxu0 %v4245_v50 }
 0x16e   :  { %1495 = vmatmul.mubr.f32.gmra.mrb[28].mxu1 %v3707_v32  ;;  %2130 = vmatmul.mubr.f32.gmra.mrb[30].mxu0 %v3714_v37 }
 0x16f   :  { %1500 = vmatprep.mubr.f32.mxu1 %v4245_v50 }
 0x172   :  { %1503 = vmatmul.mubr.f32.gmra.mrb[30].mxu1 %v3717_v6 }
 0x205   :  { %v2026_v28 = vpop.f32.mrb[0].mxu0 }
 0x206   :  { %v2028_v17 = vpop.f32.mrb[1].mxu0 }
 0x209   :  { %v1384_v5 = vpop.f32.mrb[0].mxu1  ;;  %v2033_v30 = vpop.f32.mrb[2].mxu0 }
 0x20a   :  { %v2568_v46 = vadd.f32 %v2026_v28, %v1384_v5  ;;  %v1386_v57 = vpop.f32.mrb[1].mxu1  ;;  %v2035_v24 = vpop.f32.mrb[3].mxu0 }
 0x20b   :  { %v2569_v61 = vadd.f32 %v2028_v17, %v1386_v57 }
 0x20c   :  { %v2142_v21 = vsel %vm2136_vm4, %v4302_v44, %v2568_v46 }
 0x20d   :  { %v2216_v3 = vrot.slane %v2142_v21, 7  ;;  %v2143_v50 = vsel %vm2139_vm5, %v4302_v44, %v2569_v61  ;;  %v1392_v35 = vpop.f32.mrb[2].mxu1  ;;  %v2040_v31 = vpop.f32.mrb[4].mxu0 }
 0x20e   :  { %v2217_v2 = vrot.slane %v2143_v50, 7  ;;  %v2570_v52 = vadd.f32 %v2033_v30, %v1392_v35  ;;  %v1394_v32 = vpop.f32.mrb[3].mxu1  ;;  %v2042_v39 = vpop.f32.mrb[5].mxu0 }
 0x20f   :  { %2312 = vst [vmem:[%s4154_s3] sm:$0xfe] %v2216_v3  ;;  %v2571_v1 = vadd.f32 %v2035_v24, %v1394_v32 }
 0x210   :  { %2314 = vst.msk [vmem:[%s4154_s3 + $0x8] sm:$0xfe] %vm2313_vm10, %v2217_v2  ;;  %v2144_v14 = vsel %vm2136_vm4, %v4302_v44, %v2570_v52 }
 0x211   :  { %v2218_v4 = vrot.slane %v2144_v14, 7  ;;  %v2145_v36 = vsel %vm2139_vm5, %v4302_v44, %v2571_v1  ;;  %v1400_v9 = vpop.f32.mrb[4].mxu1  ;;  %v2047_v20 = vpop.f32.mrb[6].mxu0 }
 0x212   :  { %v2220_v37 = vrot.slane %v2145_v36, 7  ;;  %v2572_v6 = vadd.f32 %v2040_v31, %v1400_v9  ;;  %v1402_v62 = vpop.f32.mrb[5].mxu1  ;;  %v2049_v11 = vpop.f32.mrb[7].mxu0 }
 0x213   :  { %v2219_v25 = vsel %vm2215_vm12, %v2216_v3, %v2218_v4  ;;  %v2573_v22 = vadd.f32 %v2042_v39, %v1402_v62 }
 0x214   :  { %2315 = vst [vmem:[%s4154_s3 + $0x10] sm:$0xff] %v2219_v25  ;;  %v2221_v0 = vsel %vm2215_vm12, %v2217_v2, %v2220_v37  ;;  %v2146_v16 = vsel %vm2136_vm4, %v4302_v44, %v2572_v6 }
 0x215   :  { %2317 = vst.msk [vmem:[%s4154_s3 + $0x18] sm:$0xff] %vm2316_vm0, %v2221_v0  ;;  %v2222_v33 = vrot.slane %v2146_v16, 7  ;;  %v2147_v12 = vsel %vm2139_vm5, %v4302_v44, %v2573_v22  ;;  %v1408_v23 = vpop.f32.mrb[6].mxu1  ;;  %v2054_v29 = vpop.f32.mrb[8].mxu0 }
 0x216   :  { %v2224_v38 = vrot.slane %v2147_v12, 7  ;;  %v2574_v60 = vadd.f32 %v2047_v20, %v1408_v23  ;;  %v1410_v45 = vpop.f32.mrb[7].mxu1  ;;  %v2056_v48 = vpop.f32.mrb[9].mxu0 }
 0x217   :  { %v2223_v8 = vsel %vm2215_vm12, %v2218_v4, %v2222_v33  ;;  %v2575_v53 = vadd.f32 %v2049_v11, %v1410_v45 }
 0x218   :  { %2318 = vst [vmem:[%s4154_s3 + $0x20] sm:$0xff] %v2223_v8  ;;  %v2225_v56 = vsel %vm2215_vm12, %v2220_v37, %v2224_v38  ;;  %v2148_v13 = vsel %vm2136_vm4, %v4302_v44, %v2574_v60 }
 0x219   :  { %2319 = vst.msk [vmem:[%s4154_s3 + $0x28] sm:$0xff] %vm2316_vm0, %v2225_v56  ;;  %v2226_v54 = vrot.slane %v2148_v13, 7  ;;  %v2149_v49 = vsel %vm2139_vm5, %v4302_v44, %v2575_v53  ;;  %v1416_v40 = vpop.f32.mrb[8].mxu1  ;;  %v2061_v47 = vpop.f32.mrb[10].mxu0 }
 0x21a   :  { %v2228_v27 = vrot.slane %v2149_v49, 7  ;;  %v2576_v34 = vadd.f32 %v2054_v29, %v1416_v40  ;;  %v1418_v26 = vpop.f32.mrb[9].mxu1  ;;  %v2063_v19 = vpop.f32.mrb[11].mxu0 }
 0x21b   :  { %v2227_v41 = vsel %vm2215_vm12, %v2222_v33, %v2226_v54  ;;  %v2577_v55 = vadd.f32 %v2056_v48, %v1418_v26 }
 0x21c   :  { %2320 = vst [vmem:[%s4154_s3 + $0x30] sm:$0xff] %v2227_v41  ;;  %v2229_v18 = vsel %vm2215_vm12, %v2224_v38, %v2228_v27  ;;  %v2150_v59 = vsel %vm2136_vm4, %v4302_v44, %v2576_v34 }
 0x21d   :  { %2321 = vst.msk [vmem:[%s4154_s3 + $0x38] sm:$0xff] %vm2316_vm0, %v2229_v18  ;;  %v2230_v58 = vrot.slane %v2150_v59, 7  ;;  %v2151_v10 = vsel %vm2139_vm5, %v4302_v44, %v2577_v55  ;;  %v1424_v63 = vpop.f32.mrb[10].mxu1  ;;  %v2068_v51 = vpop.f32.mrb[12].mxu0 }
 0x21e   :  { %v2232_v15 = vrot.slane %v2151_v10, 7  ;;  %v2578_v7 = vadd.f32 %v2061_v47, %v1424_v63  ;;  %v1426_v28 = vpop.f32.mrb[11].mxu1  ;;  %v2070_v17 = vpop.f32.mrb[13].mxu0 }
 0x21f   :  { %v2231_v5 = vsel %vm2215_vm12, %v2226_v54, %v2230_v58  ;;  %v2579_v30 = vadd.f32 %v2063_v19, %v1426_v28 }
 0x220   :  { %2322 = vst [vmem:[%s4154_s3 + $0x40] sm:$0xff] %v2231_v5  ;;  %v2233_v46 = vsel %vm2215_vm12, %v2228_v27, %v2232_v15  ;;  %v2152_v57 = vsel %vm2136_vm4, %v4302_v44, %v2578_v7 }
 0x221   :  { %2323 = vst.msk [vmem:[%s4154_s3 + $0x48] sm:$0xff] %vm2316_vm0, %v2233_v46  ;;  %v2234_v24 = vrot.slane %v2152_v57, 7  ;;  %v2153_v61 = vsel %vm2139_vm5, %v4302_v44, %v2579_v30  ;;  %v1432_v21 = vpop.f32.mrb[12].mxu1  ;;  %v2075_v3 = vpop.f32.mrb[14].mxu0 }
 0x222   :  { %v2236_v50 = vrot.slane %v2153_v61, 7  ;;  %v2580_v35 = vadd.f32 %v2068_v51, %v1432_v21  ;;  %v1434_v31 = vpop.f32.mrb[13].mxu1  ;;  %v2077_v2 = vpop.f32.mrb[15].mxu0 }
 0x223   :  { %v2235_v52 = vsel %vm2215_vm12, %v2230_v58, %v2234_v24  ;;  %v2581_v32 = vadd.f32 %v2070_v17, %v1434_v31 }
 0x224   :  { %2324 = vst [vmem:[%s4154_s3 + $0x50] sm:$0xff] %v2235_v52  ;;  %v2237_v39 = vsel %vm2215_vm12, %v2232_v15, %v2236_v50  ;;  %v2154_v1 = vsel %vm2136_vm4, %v4302_v44, %v2580_v35 }
 0x225   :  { %2325 = vst.msk [vmem:[%s4154_s3 + $0x58] sm:$0xff] %vm2316_vm0, %v2237_v39  ;;  %v2238_v14 = vrot.slane %v2154_v1, 7  ;;  %v2155_v4 = vsel %vm2139_vm5, %v4302_v44, %v2581_v32  ;;  %v1440_v36 = vpop.f32.mrb[14].mxu1  ;;  %v2082_v9 = vpop.f32.mrb[16].mxu0 }
 0x226   :  { %v2240_v20 = vrot.slane %v2155_v4, 7  ;;  %v2582_v37 = vadd.f32 %v2075_v3, %v1440_v36  ;;  %v1442_v6 = vpop.f32.mrb[15].mxu1  ;;  %v2084_v62 = vpop.f32.mrb[17].mxu0 }
 0x227   :  { %v2239_v11 = vsel %vm2215_vm12, %v2234_v24, %v2238_v14  ;;  %v2583_v25 = vadd.f32 %v2077_v2, %v1442_v6 }
 0x228   :  { %2326 = vst [vmem:[%s4154_s3 + $0x60] sm:$0xff] %v2239_v11  ;;  %v2241_v22 = vsel %vm2215_vm12, %v2236_v50, %v2240_v20  ;;  %v2156_v0 = vsel %vm2136_vm4, %v4302_v44, %v2582_v37 }
 0x229   :  { %2327 = vst.msk [vmem:[%s4154_s3 + $0x68] sm:$0xff] %vm2316_vm0, %v2241_v22  ;;  %v2242_v16 = vrot.slane %v2156_v0, 7  ;;  %v2157_v33 = vsel %vm2139_vm5, %v4302_v44, %v2583_v25  ;;  %v1448_v12 = vpop.f32.mrb[16].mxu1  ;;  %v2089_v23 = vpop.f32.mrb[18].mxu0 }
 0x22a   :  { %v2244_v29 = vrot.slane %v2157_v33, 7  ;;  %v2584_v38 = vadd.f32 %v2082_v9, %v1448_v12  ;;  %v1450_v60 = vpop.f32.mrb[17].mxu1  ;;  %v2091_v45 = vpop.f32.mrb[19].mxu0 }
 0x22b   :  { %v2243_v48 = vsel %vm2215_vm12, %v2238_v14, %v2242_v16  ;;  %v2585_v8 = vadd.f32 %v2084_v62, %v1450_v60 }
 0x22c   :  { %2328 = vst [vmem:[%s4154_s3 + $0x70] sm:$0xff] %v2243_v48  ;;  %v2245_v53 = vsel %vm2215_vm12, %v2240_v20, %v2244_v29  ;;  %v2158_v56 = vsel %vm2136_vm4, %v4302_v44, %v2584_v38 }
 0x22d   :  { %2329 = vst.msk [vmem:[%s4154_s3 + $0x78] sm:$0xff] %vm2316_vm0, %v2245_v53  ;;  %v2246_v13 = vrot.slane %v2158_v56, 7  ;;  %v2159_v54 = vsel %vm2139_vm5, %v4302_v44, %v2585_v8  ;;  %v1456_v49 = vpop.f32.mrb[18].mxu1  ;;  %v2096_v40 = vpop.f32.mrb[20].mxu0 }
 0x22e   :  { %v2248_v47 = vrot.slane %v2159_v54, 7  ;;  %v2586_v27 = vadd.f32 %v2089_v23, %v1456_v49  ;;  %v1458_v34 = vpop.f32.mrb[19].mxu1  ;;  %v2098_v26 = vpop.f32.mrb[21].mxu0 }
 0x22f   :  { %v2247_v19 = vsel %vm2215_vm12, %v2242_v16, %v2246_v13  ;;  %v2587_v41 = vadd.f32 %v2091_v45, %v1458_v34 }
 0x230   :  { %2330 = vst [vmem:[%s4154_s3 + $0x80] sm:$0xff] %v2247_v19  ;;  %v2249_v55 = vsel %vm2215_vm12, %v2244_v29, %v2248_v47  ;;  %v2160_v18 = vsel %vm2136_vm4, %v4302_v44, %v2586_v27 }
 0x231   :  { %2331 = vst.msk [vmem:[%s4154_s3 + $0x88] sm:$0xff] %vm2316_vm0, %v2249_v55  ;;  %v2250_v59 = vrot.slane %v2160_v18, 7  ;;  %v2161_v58 = vsel %vm2139_vm5, %v4302_v44, %v2587_v41  ;;  %v1464_v10 = vpop.f32.mrb[20].mxu1  ;;  %v2103_v63 = vpop.f32.mrb[22].mxu0 }
 0x232   :  { %v2252_v51 = vrot.slane %v2161_v58, 7  ;;  %v2588_v15 = vadd.f32 %v2096_v40, %v1464_v10  ;;  %v1466_v7 = vpop.f32.mrb[21].mxu1  ;;  %v2105_v28 = vpop.f32.mrb[23].mxu0 }
 0x233   :  { %v2251_v17 = vsel %vm2215_vm12, %v2246_v13, %v2250_v59  ;;  %v2589_v5 = vadd.f32 %v2098_v26, %v1466_v7 }
 0x234   :  { %2332 = vst [vmem:[%s4154_s3 + $0x90] sm:$0xff] %v2251_v17  ;;  %v2253_v30 = vsel %vm2215_vm12, %v2248_v47, %v2252_v51  ;;  %v2162_v46 = vsel %vm2136_vm4, %v4302_v44, %v2588_v15 }
 0x235   :  { %2333 = vst.msk [vmem:[%s4154_s3 + $0x98] sm:$0xff] %vm2316_vm0, %v2253_v30  ;;  %v2254_v57 = vrot.slane %v2162_v46, 7  ;;  %v2163_v24 = vsel %vm2139_vm5, %v4302_v44, %v2589_v5  ;;  %v1472_v61 = vpop.f32.mrb[22].mxu1  ;;  %v2110_v21 = vpop.f32.mrb[24].mxu0 }
 0x236   :  { %v2256_v3 = vrot.slane %v2163_v24, 7  ;;  %v2590_v50 = vadd.f32 %v2103_v63, %v1472_v61  ;;  %v1474_v35 = vpop.f32.mrb[23].mxu1  ;;  %v2112_v31 = vpop.f32.mrb[25].mxu0 }
 0x237   :  { %v2255_v2 = vsel %vm2215_vm12, %v2250_v59, %v2254_v57  ;;  %v2591_v52 = vadd.f32 %v2105_v28, %v1474_v35 }
 0x238   :  { %2334 = vst [vmem:[%s4154_s3 + $0xa0] sm:$0xff] %v2255_v2  ;;  %v2257_v32 = vsel %vm2215_vm12, %v2252_v51, %v2256_v3  ;;  %v2164_v39 = vsel %vm2136_vm4, %v4302_v44, %v2590_v50 }
 0x239   :  { %2335 = vst.msk [vmem:[%s4154_s3 + $0xa8] sm:$0xff] %vm2316_vm0, %v2257_v32  ;;  %v2258_v1 = vrot.slane %v2164_v39, 7  ;;  %v2165_v14 = vsel %vm2139_vm5, %v4302_v44, %v2591_v52  ;;  %v1480_v4 = vpop.f32.mrb[24].mxu1  ;;  %v2117_v36 = vpop.f32.mrb[26].mxu0 }
 0x23a   :  { %v2260_v9 = vrot.slane %v2165_v14, 7  ;;  %v2592_v20 = vadd.f32 %v2110_v21, %v1480_v4  ;;  %v1482_v37 = vpop.f32.mrb[25].mxu1  ;;  %v2119_v6 = vpop.f32.mrb[27].mxu0 }
 0x23b   :  { %v2259_v62 = vsel %vm2215_vm12, %v2254_v57, %v2258_v1  ;;  %v2593_v11 = vadd.f32 %v2112_v31, %v1482_v37 }
 0x23c   :  { %2336 = vst [vmem:[%s4154_s3 + $0xb0] sm:$0xff] %v2259_v62  ;;  %v2261_v25 = vsel %vm2215_vm12, %v2256_v3, %v2260_v9  ;;  %v2166_v22 = vsel %vm2136_vm4, %v4302_v44, %v2592_v20 }
 0x23d   :  { %2337 = vst.msk [vmem:[%s4154_s3 + $0xb8] sm:$0xff] %vm2316_vm0, %v2261_v25  ;;  %v2262_v0 = vrot.slane %v2166_v22, 7  ;;  %v2167_v16 = vsel %vm2139_vm5, %v4302_v44, %v2593_v11  ;;  %v1488_v33 = vpop.f32.mrb[26].mxu1  ;;  %v2124_v12 = vpop.f32.mrb[28].mxu0 }
 0x23e   :  { %v2264_v23 = vrot.slane %v2167_v16, 7  ;;  %v2594_v29 = vadd.f32 %v2117_v36, %v1488_v33  ;;  %v1490_v38 = vpop.f32.mrb[27].mxu1  ;;  %v2126_v60 = vpop.f32.mrb[29].mxu0 }
 0x23f   :  { %v2263_v45 = vsel %vm2215_vm12, %v2258_v1, %v2262_v0  ;;  %v2595_v48 = vadd.f32 %v2119_v6, %v1490_v38 }
 0x240   :  { %2338 = vst [vmem:[%s4154_s3 + $0xc0] sm:$0xff] %v2263_v45  ;;  %v2265_v8 = vsel %vm2215_vm12, %v2260_v9, %v2264_v23  ;;  %v2168_v53 = vsel %vm2136_vm4, %v4302_v44, %v2594_v29 }
 0x241   :  { %2339 = vst.msk [vmem:[%s4154_s3 + $0xc8] sm:$0xff] %vm2316_vm0, %v2265_v8  ;;  %v2266_v56 = vrot.slane %v2168_v53, 7  ;;  %v2169_v13 = vsel %vm2139_vm5, %v4302_v44, %v2595_v48  ;;  %v1496_v54 = vpop.f32.mrb[28].mxu1  ;;  %v2131_v49 = vpop.f32.mrb[30].mxu0 }
 0x242   :  { %v2268_v40 = vrot.slane %v2169_v13, 7  ;;  %v2596_v47 = vadd.f32 %v2124_v12, %v1496_v54  ;;  %v1498_v27 = vpop.f32.mrb[29].mxu1  ;;  %v2133_v34 = vpop.f32.mrb[31].mxu0 }
 0x243   :  { %v2267_v26 = vsel %vm2215_vm12, %v2262_v0, %v2266_v56  ;;  %v2597_v19 = vadd.f32 %v2126_v60, %v1498_v27 }
 0x244   :  { %2340 = vst [vmem:[%s4154_s3 + $0xd0] sm:$0xff] %v2267_v26  ;;  %v2269_v41 = vsel %vm2215_vm12, %v2264_v23, %v2268_v40  ;;  %v2170_v55 = vsel %vm2136_vm4, %v4302_v44, %v2596_v47 }
 0x245   :  { %2341 = vst.msk [vmem:[%s4154_s3 + $0xd8] sm:$0xff] %vm2316_vm0, %v2269_v41  ;;  %v2270_v18 = vrot.slane %v2170_v55, 7  ;;  %v2171_v59 = vsel %vm2139_vm5, %v4302_v44, %v2597_v19  ;;  %v1504_v58 = vpop.f32.mrb[30].mxu1 }
 0x246   :  { %v2272_v10 = vrot.slane %v2171_v59, 7  ;;  %v2598_v63 = vadd.f32 %v2131_v49, %v1504_v58  ;;  %v1506_v51 = vpop.f32.mrb[31].mxu1 }
 0x247   :  { %v2271_v15 = vsel %vm2215_vm12, %v2266_v56, %v2270_v18  ;;  %v2599_v7 = vadd.f32 %v2133_v34, %v1506_v51 }
 0x248   :  { %2342 = vst [vmem:[%s4154_s3 + $0xe0] sm:$0xff] %v2271_v15  ;;  %v2273_v28 = vsel %vm2215_vm12, %v2268_v40, %v2272_v10  ;;  %v2172_v17 = vsel %vm2136_vm4, %v4302_v44, %v2598_v63 }
 0x249   :  { %2343 = vst.msk [vmem:[%s4154_s3 + $0xe8] sm:$0xff] %vm2316_vm0, %v2273_v28  ;;  %v2274_v5 = vrot.slane %v2172_v17, 7  ;;  %v2173_v30 = vsel %vm2139_vm5, %v4302_v44, %v2599_v7 }
 0x24a   :  { %v2276_v46 = vrot.slane %v2173_v30, 7 }
 0x24b   :  { %v2275_v57 = vsel %vm2215_vm12, %v2270_v18, %v2274_v5  ;;  %2346 = vst [vmem:[%s4154_s3 + $0x100] sm:$0x1] %v2274_v5 }
 0x24c   :  { %2344 = vst [vmem:[%s4154_s3 + $0xf0] sm:$0xff] %v2275_v57  ;;  %v2277_v43 = vsel %vm2215_vm12, %v2272_v10, %v2276_v46  ;;  %2348 = vst.msk [vmem:[%s4154_s3 + $0x108] sm:$0x1] %vm2347_vm1, %v2276_v46 }
 0x24d   :  { %2345 = vst.msk [vmem:[%s4154_s3 + $0xf8] sm:$0xff] %vm2316_vm0, %v2277_v43 }
 0x24e   :  { %2353 = vsyncpa [#allocation4], 1 }
 0x24f   :  { %2354 = vsyncpa [#allocation5], 1 }

</bundles_post_ra>
